<compile_context>
chip_gen: v7x
topology: tpu7x:2x2x1
jax: 0.10.0
libtpu: 0.0.40
codegen_flags: <defaults>
</compile_context>

<pallas_src>
import jax
import jax.numpy as jnp
from jax.experimental import pallas as pl
from jax.experimental.pallas import tpu as pltpu

LANE = 128
BF16_PACK = 16          # bf16 packs 16 rows per sublane group
BN_EPS = 1e-5


def _round_up(x, m):
    return ((x + m - 1) // m) * m


# ----------------------------------------------------------------------------
# Pallas kernel: fused MLP head (backbone projection pre-folded into fc1)
# ----------------------------------------------------------------------------
def fused_head_kernel(
    pooled_ref,            # [TB, Cp]     bf16  (GAP'd image, channels zero-padded)
    w1_ref, t1_ref,        # [Cp, 1024]   bf16 (wproj & BN folded), [1, 1024] f32
    w2_ref, t2_ref,        # [1024, 512]  bf16, [1, 512]  f32  (BN folded in)
    w3_ref, t3_ref,        # [512, 256]   bf16, [1, 256]  f32
    w4_ref, b4_ref,        # [256, 128]   bf16, [1, 128]  f32  (classes padded to 128)
    out_ref,               # [TB, 128]    f32
):
    f32 = jnp.float32
    bf16 = jnp.bfloat16

    # fc1 (backbone-stub projection folded in) -> folded BN -> ReLU
    # (dropout layers are identity in eval mode)
    h = jnp.dot(pooled_ref[...], w1_ref[...], preferred_element_type=f32)
    h = jnp.maximum(h + t1_ref[...], 0.0)

    # fc2 -> folded BN -> ReLU
    h = jnp.dot(h.astype(bf16), w2_ref[...], preferred_element_type=f32)
    h = jnp.maximum(h + t2_ref[...], 0.0)

    # fc3 -> folded BN -> ReLU
    h = jnp.dot(h.astype(bf16), w3_ref[...], preferred_element_type=f32)
    h = jnp.maximum(h + t3_ref[...], 0.0)

    # fc4 (logits, lane-dense padded output, f32 epilogue)
    out_ref[...] = (
        jnp.dot(h.astype(bf16), w4_ref[...], preferred_element_type=f32) + b4_ref[...]
    )


def fused_head(pooled_pad, ops, tb):
    """Batch-gridded pallas_call; weights stay VMEM-resident across the grid."""
    bp, cp = pooled_pad.shape
    ncls_pad = ops["w4"].shape[1]
    grid = (bp // tb,)

    def resident(arr):
        # Full-array block, constant block index => loaded once, reused per tile.
        return pl.BlockSpec(arr.shape, lambda i: (0, 0))

    in_specs = [
        pl.BlockSpec((tb, cp), lambda i: (i, 0)),        # pooled: tiled over batch
        resident(ops["w1"]), resident(ops["t1"]),
        resident(ops["w2"]), resident(ops["t2"]),
        resident(ops["w3"]), resident(ops["t3"]),
        resident(ops["w4"]), resident(ops["b4"]),
    ]
    out_spec = pl.BlockSpec((tb, ncls_pad), lambda i: (i, 0))

    return pl.pallas_call(
        fused_head_kernel,
        out_shape=jax.ShapeDtypeStruct((bp, ncls_pad), jnp.float32),
        grid=grid,
        in_specs=in_specs,
        out_specs=out_spec,
        compiler_params=pltpu.CompilerParams(
            dimension_semantics=("parallel",),           # megacore sharding on v7x
            vmem_limit_bytes=16 << 20,
        ),
    )(
        pooled_pad,
        ops["w1"], ops["t1"],
        ops["w2"], ops["t2"],
        ops["w3"], ops["t3"],
        ops["w4"], ops["b4"],
    )


# ----------------------------------------------------------------------------
# Parameter construction + BN / projection folding (wrapper-side glue)
# ----------------------------------------------------------------------------
def make_params(key, num_classes, c_in=3):
    """Synthetic, deterministic params.

    Returns (raw, ops):
      raw  : unfolded f32 params (PyTorch-semantics reference)
      ops  : kernel operands (bf16 weights with BN scale folded in, f32 shifts,
             projection folded into fc1, padded w4 / b4)
    """
    ks = jax.random.split(key, 16)
    ki = 0
    raw, ops = {}, {}

    # Backbone-stub projection: [c_in, 1024]
    wproj = jax.random.normal(ks[ki], (c_in, 1024), jnp.float32) * (2.0 / c_in) ** 0.5
    ki += 1
    raw["wproj"] = wproj

    dims = [(1024, 1024), (1024, 512), (512, 256), (256, num_classes)]
    ncls_pad = _round_up(num_classes, LANE)
    cp = _round_up(max(c_in, BF16_PACK), BF16_PACK)      # 16, not 128

    for i, (din, dout) in enumerate(dims, start=1):
        w = jax.random.normal(ks[ki], (din, dout), jnp.float32) * (2.0 / din) ** 0.5
        ki += 1
        b = 0.01 * jax.random.normal(ks[ki], (1, dout), jnp.float32)
        ki += 1
        raw[f"w{i}"] = w
        raw[f"b{i}"] = b

        if i <= 3:
            # BatchNorm1d, eval-mode running stats
            gamma = 1.0 + 0.05 * jax.random.normal(ks[ki], (1, dout), jnp.float32)
            ki += 1
            beta = 0.05 * jax.random.normal(ks[ki], (1, dout), jnp.float32)
            ki += 1
            mean = 0.1 * jnp.sin(jnp.arange(dout, dtype=jnp.float32))[None, :]
            var = 1.0 + 0.1 * jnp.cos(jnp.arange(dout, dtype=jnp.float32))[None, :] ** 2
            raw[f"gamma{i}"], raw[f"beta{i}"] = gamma, beta
            raw[f"mean{i}"], raw[f"var{i}"] = mean, var

            # Fold: relu((xW + b)*s + t) == relu(x(W*s) + (b*s + t))
            scale = gamma / jnp.sqrt(var + BN_EPS)
            shift = beta - mean * scale
            if i == 1:
                # Also fold the (linear) backbone-stub projection into fc1:
                # relu(((x@wproj)@w1 + b1)*s + t) == relu(x@(wproj@(w1*s)) + (b1*s + t))
                w1_fold = wproj @ (w * scale)            # [c_in, 1024], f32 fold
                w1_pad = jnp.zeros((cp, dout), jnp.float32).at[:c_in, :].set(w1_fold)
                ops["w1"] = w1_pad.astype(jnp.bfloat16)
            else:
                ops[f"w{i}"] = (w * scale).astype(jnp.bfloat16)
            ops[f"t{i}"] = (b * scale + shift).astype(jnp.float32)
        else:
            # fc4: pad classes to a lane-dense 128-wide output
            w4p = jnp.zeros((din, ncls_pad), jnp.float32).at[:, :dout].set(w)
            b4p = jnp.zeros((1, ncls_pad), jnp.float32).at[:, :dout].set(b)
            ops["w4"] = w4p.astype(jnp.bfloat16)
            ops["b4"] = b4p

    return raw, ops


def pick_batch_tile(batch):
    """bf16 rows pack 16/sublane group; 256 fills the v6e/v7x MXU M dim."""
    return min(256, _round_up(max(batch, BF16_PACK), BF16_PACK))


def prepare_pooled(x, ops, tb):
    """Backbone stand-in GAP + batch/channel padding for the kernel."""
    B, C = x.shape[0], x.shape[1]
    pooled = jnp.mean(x, axis=(2, 3))                     # [B, C] global average pool
    cp = ops["w1"].shape[0]
    bp = _round_up(max(B, tb), tb)
    pooled_pad = (
        jnp.zeros((bp, cp), jnp.bfloat16).at[:B, :C].set(pooled.astype(jnp.bfloat16))
    )
    return pooled_pad


def custom_model_forward(x, ops, num_classes):
    B = x.shape[0]
    tb = pick_batch_tile(B)
    pooled_pad = prepare_pooled(x, ops, tb)               # [Bp, Cp] bf16
    out_pad = fused_head(pooled_pad, ops, tb)             # [Bp, 128] f32
    return out_pad[:B, :num_classes]                      # slice real logits


# ----------------------------------------------------------------------------
# References (for correctness check)
# ----------------------------------------------------------------------------
def ref_head_bf16(pooled_pad, ops):
    """Mirrors the kernel math exactly (folded bf16 weights, f32 accumulation)."""
    def mm(a, w):
        return jnp.dot(a.astype(jnp.bfloat16), w, preferred_element_type=jnp.float32)

    h = jnp.maximum(mm(pooled_pad, ops["w1"]) + ops["t1"], 0.0)
    h = jnp.maximum(mm(h, ops["w2"]) + ops["t2"], 0.0)
    h = jnp.maximum(mm(h, ops["w3"]) + ops["t3"], 0.0)
    return mm(h, ops["w4"]) + ops["b4"]


def ref_full_f32(x, raw, num_classes):
    """Original PyTorch-semantics math in f32 (unfolded BN/projection, eval mode)."""
    pooled = jnp.mean(x, axis=(2, 3))
    feat = pooled @ raw["wproj"]

    def layer(h, i):
        h = h @ raw[f"w{i}"] + raw[f"b{i}"]
        h = (h - raw[f"mean{i}"]) / jnp.sqrt(raw[f"var{i}"] + BN_EPS)
        h = h * raw[f"gamma{i}"] + raw[f"beta{i}"]
        return jnp.maximum(h, 0.0)

    h = layer(feat, 1)
    h = layer(h, 2)
    h = layer(h, 3)
    return h @ raw["w4"] + raw["b4"]


# ----------------------------------------------------------------------------
if __name__ == "__main__":
    key = jax.random.PRNGKey(0)
    k_x, k_params = jax.random.split(key, 2)

    B, C, H, W = 2, 3, 16, 16
    num_classes = 10

    x = jax.random.normal(k_x, (B, C, H, W), jnp.float32)
    raw, ops = make_params(k_params, num_classes, c_in=C)

    fwd = jax.jit(lambda xx: custom_model_forward(xx, ops, num_classes))
    out = jax.block_until_ready(fwd(x))

    assert out.shape == (B, num_classes), out.shape
    assert out.dtype == jnp.float32, out.dtype

    # Check 1: kernel vs identical folded bf16/f32-accum math in plain JAX (tight).
    tb = pick_batch_tile(B)
    pooled_pad = prepare_pooled(x, ops, tb)
    ref_bf16 = ref_head_bf16(pooled_pad, ops)[:B, :num_classes]
    assert jnp.allclose(out, ref_bf16, atol=1e-2, rtol=1e-2), (
        float(jnp.max(jnp.abs(out - ref_bf16)))
    )

    # Check 2: kernel vs original unfolded f32 semantics (loose: bf16 weights + folds).
    ref_f32 = ref_full_f32(x, raw, num_classes)
    assert jnp.allclose(out, ref_f32, atol=3e-2, rtol=3e-2), (
        float(jnp.max(jnp.abs(out - ref_f32)))
    )

    print("KERNEL_OK")
</pallas_src>

<mosaic_0001>
module attributes {stable_mosaic.version = 11 : i64} {
  func.func @fused_head_kernel(%arg0: i32, %arg1: memref<16x16xbf16, #tpu.memory_space<vmem>>, %arg2: memref<16x1024xbf16, #tpu.memory_space<vmem>>, %arg3: memref<1x1024xf32, #tpu.memory_space<vmem>>, %arg4: memref<1024x512xbf16, #tpu.memory_space<vmem>>, %arg5: memref<1x512xf32, #tpu.memory_space<vmem>>, %arg6: memref<512x256xbf16, #tpu.memory_space<vmem>>, %arg7: memref<1x256xf32, #tpu.memory_space<vmem>>, %arg8: memref<256x128xbf16, #tpu.memory_space<vmem>>, %arg9: memref<1x128xf32, #tpu.memory_space<vmem>>, %arg10: memref<16x128xf32, #tpu.memory_space<vmem>>) attributes {dimension_semantics = [#tpu.dimension_semantics<parallel>], iteration_bounds = array<i64: 1>, scalar_prefetch = 0 : i64, scratch_operands = 0 : i64, tpu.core_type = #tpu.core_type<tc>, window_params = [{transform_indices = @transform_0, window_bounds = array<i64: 16, 16>}, {pipeline_mode = #tpu.pipeline_mode<synchronous>, transform_indices = @transform_1, window_bounds = array<i64: 16, 1024>}, {pipeline_mode = #tpu.pipeline_mode<synchronous>, transform_indices = @transform_2, window_bounds = array<i64: 1, 1024>}, {pipeline_mode = #tpu.pipeline_mode<synchronous>, transform_indices = @transform_3, window_bounds = array<i64: 1024, 512>}, {pipeline_mode = #tpu.pipeline_mode<synchronous>, transform_indices = @transform_4, window_bounds = array<i64: 1, 512>}, {pipeline_mode = #tpu.pipeline_mode<synchronous>, transform_indices = @transform_5, window_bounds = array<i64: 512, 256>}, {pipeline_mode = #tpu.pipeline_mode<synchronous>, transform_indices = @transform_6, window_bounds = array<i64: 1, 256>}, {pipeline_mode = #tpu.pipeline_mode<synchronous>, transform_indices = @transform_7, window_bounds = array<i64: 256, 128>}, {pipeline_mode = #tpu.pipeline_mode<synchronous>, transform_indices = @transform_8, window_bounds = array<i64: 1, 128>}, {transform_indices = @transform_9, window_bounds = array<i64: 16, 128>}]} {
    %c0 = arith.constant 0 : index
    %c0_0 = arith.constant 0 : index
    %0 = vector.load %arg1[%c0, %c0_0] : memref<16x16xbf16, #tpu.memory_space<vmem>>, vector<16x16xbf16>
    %c0_1 = arith.constant 0 : index
    %c0_2 = arith.constant 0 : index
    %1 = vector.load %arg2[%c0_1, %c0_2] : memref<16x1024xbf16, #tpu.memory_space<vmem>>, vector<16x1024xbf16>
    %cst = arith.constant dense<0.000000e+00> : vector<16x1024xf32>
    %2 = tpu.matmul %0, %1, %cst {dimension_numbers = #tpu.dot_dimension_numbers<[1], [0], [0], [1], [0, 0, 1, 1], [], []>} : vector<16x16xbf16>, vector<16x1024xbf16>, vector<16x1024xf32> -> vector<16x1024xf32>
    %c0_3 = arith.constant 0 : index
    %c0_4 = arith.constant 0 : index
    %3 = vector.load %arg3[%c0_3, %c0_4] : memref<1x1024xf32, #tpu.memory_space<vmem>>, vector<1x1024xf32>
    %4 = vector.broadcast %3 : vector<1x1024xf32> to vector<16x1024xf32>
    %5 = arith.addf %2, %4 : vector<16x1024xf32>
    %cst_5 = arith.constant 0.000000e+00 : f32
    %6 = vector.broadcast %cst_5 : f32 to vector<16x1024xf32>
    %7 = arith.maximumf %5, %6 : vector<16x1024xf32>
    %8 = arith.truncf %7 : vector<16x1024xf32> to vector<16x1024xbf16>
    %c0_6 = arith.constant 0 : index
    %c0_7 = arith.constant 0 : index
    %9 = vector.load %arg4[%c0_6, %c0_7] : memref<1024x512xbf16, #tpu.memory_space<vmem>>, vector<1024x512xbf16>
    %cst_8 = arith.constant dense<0.000000e+00> : vector<16x512xf32>
    %10 = tpu.matmul %8, %9, %cst_8 {dimension_numbers = #tpu.dot_dimension_numbers<[1], [0], [0], [1], [0, 0, 1, 1], [], []>} : vector<16x1024xbf16>, vector<1024x512xbf16>, vector<16x512xf32> -> vector<16x512xf32>
    %c0_9 = arith.constant 0 : index
    %c0_10 = arith.constant 0 : index
    %11 = vector.load %arg5[%c0_9, %c0_10] : memref<1x512xf32, #tpu.memory_space<vmem>>, vector<1x512xf32>
    %12 = vector.broadcast %11 : vector<1x512xf32> to vector<16x512xf32>
    %13 = arith.addf %10, %12 : vector<16x512xf32>
    %cst_11 = arith.constant 0.000000e+00 : f32
    %14 = vector.broadcast %cst_11 : f32 to vector<16x512xf32>
    %15 = arith.maximumf %13, %14 : vector<16x512xf32>
    %16 = arith.truncf %15 : vector<16x512xf32> to vector<16x512xbf16>
    %c0_12 = arith.constant 0 : index
    %c0_13 = arith.constant 0 : index
    %17 = vector.load %arg6[%c0_12, %c0_13] : memref<512x256xbf16, #tpu.memory_space<vmem>>, vector<512x256xbf16>
    %cst_14 = arith.constant dense<0.000000e+00> : vector<16x256xf32>
    %18 = tpu.matmul %16, %17, %cst_14 {dimension_numbers = #tpu.dot_dimension_numbers<[1], [0], [0], [1], [0, 0, 1, 1], [], []>} : vector<16x512xbf16>, vector<512x256xbf16>, vector<16x256xf32> -> vector<16x256xf32>
    %c0_15 = arith.constant 0 : index
    %c0_16 = arith.constant 0 : index
    %19 = vector.load %arg7[%c0_15, %c0_16] : memref<1x256xf32, #tpu.memory_space<vmem>>, vector<1x256xf32>
    %20 = vector.broadcast %19 : vector<1x256xf32> to vector<16x256xf32>
    %21 = arith.addf %18, %20 : vector<16x256xf32>
    %cst_17 = arith.constant 0.000000e+00 : f32
    %22 = vector.broadcast %cst_17 : f32 to vector<16x256xf32>
    %23 = arith.maximumf %21, %22 : vector<16x256xf32>
    %24 = arith.truncf %23 : vector<16x256xf32> to vector<16x256xbf16>
    %c0_18 = arith.constant 0 : index
    %c0_19 = arith.constant 0 : index
    %25 = vector.load %arg8[%c0_18, %c0_19] : memref<256x128xbf16, #tpu.memory_space<vmem>>, vector<256x128xbf16>
    %cst_20 = arith.constant dense<0.000000e+00> : vector<16x128xf32>
    %26 = tpu.matmul %24, %25, %cst_20 {dimension_numbers = #tpu.dot_dimension_numbers<[1], [0], [0], [1], [0, 0, 1, 1], [], []>} : vector<16x256xbf16>, vector<256x128xbf16>, vector<16x128xf32> -> vector<16x128xf32>
    %c0_21 = arith.constant 0 : index
    %c0_22 = arith.constant 0 : index
    %27 = vector.load %arg9[%c0_21, %c0_22] : memref<1x128xf32, #tpu.memory_space<vmem>>, vector<1x128xf32>
    %28 = vector.broadcast %27 : vector<1x128xf32> to vector<16x128xf32>
    %29 = arith.addf %26, %28 : vector<16x128xf32>
    %c0_23 = arith.constant 0 : index
    %c0_24 = arith.constant 0 : index
    %30 = vector.load %arg10[%c0_23, %c0_24] : memref<16x128xf32, #tpu.memory_space<vmem>>, vector<16x128xf32>
    tpu.vector_store %arg10[%c0_23, %c0_24], %29 {strides = array<i32>} : memref<16x128xf32, #tpu.memory_space<vmem>>, vector<16x128xf32>,
    return
  }
  func.func @transform_0(%arg0: i32) -> (i32, i32) {
    %c0_i32 = arith.constant 0 : i32
    %c0_i32_0 = arith.constant 0 : i32
    return %arg0, %c0_i32 : i32, i32
  }
  func.func @transform_1(%arg0: i32) -> (i32, i32) {
    %c0_i32 = arith.constant 0 : i32
    %c0_i32_0 = arith.constant 0 : i32
    %c0_i32_1 = arith.constant 0 : i32
    return %c0_i32, %c0_i32_0 : i32, i32
  }
  func.func @transform_2(%arg0: i32) -> (i32, i32) {
    %c0_i32 = arith.constant 0 : i32
    %c0_i32_0 = arith.constant 0 : i32
    %c0_i32_1 = arith.constant 0 : i32
    return %c0_i32, %c0_i32_0 : i32, i32
  }
  func.func @transform_3(%arg0: i32) -> (i32, i32) {
    %c0_i32 = arith.constant 0 : i32
    %c0_i32_0 = arith.constant 0 : i32
    %c0_i32_1 = arith.constant 0 : i32
    return %c0_i32, %c0_i32_0 : i32, i32
  }
  func.func @transform_4(%arg0: i32) -> (i32, i32) {
    %c0_i32 = arith.constant 0 : i32
    %c0_i32_0 = arith.constant 0 : i32
    %c0_i32_1 = arith.constant 0 : i32
    return %c0_i32, %c0_i32_0 : i32, i32
  }
  func.func @transform_5(%arg0: i32) -> (i32, i32) {
    %c0_i32 = arith.constant 0 : i32
    %c0_i32_0 = arith.constant 0 : i32
    %c0_i32_1 = arith.constant 0 : i32
    return %c0_i32, %c0_i32_0 : i32, i32
  }
  func.func @transform_6(%arg0: i32) -> (i32, i32) {
    %c0_i32 = arith.constant 0 : i32
    %c0_i32_0 = arith.constant 0 : i32
    %c0_i32_1 = arith.constant 0 : i32
    return %c0_i32, %c0_i32_0 : i32, i32
  }
  func.func @transform_7(%arg0: i32) -> (i32, i32) {
    %c0_i32 = arith.constant 0 : i32
    %c0_i32_0 = arith.constant 0 : i32
    %c0_i32_1 = arith.constant 0 : i32
    return %c0_i32, %c0_i32_0 : i32, i32
  }
  func.func @transform_8(%arg0: i32) -> (i32, i32) {
    %c0_i32 = arith.constant 0 : i32
    %c0_i32_0 = arith.constant 0 : i32
    %c0_i32_1 = arith.constant 0 : i32
    return %c0_i32, %c0_i32_0 : i32, i32
  }
  func.func @transform_9(%arg0: i32) -> (i32, i32) {
    %c0_i32 = arith.constant 0 : i32
    %c0_i32_0 = arith.constant 0 : i32
    return %arg0, %c0_i32 : i32, i32
  }
}

</mosaic_0001>

<bundles_post_ra>
// kernel: _lambda_.1
= control target key start
LH: loop header
LB: loop body
LE: loop exit
PB: predicated region body
PF: predicated region fallthrough
CT: control target
= control target key end

     0   :  { %v3824_v2 = vmov 0   ;;  %vm130_vm0 = vcmask 130048   ;;  %s5004_s1 = inlined_call_operand.vmem [shape: bf16[16,1024], index: 1, kind: input, shape index: {}]   ;;  %s5005_s0 = inlined_call_operand.vmem [shape: bf16[16,16], index: 0, kind: input, shape index: {}]   ;;  %s5006_s3 = inlined_call_operand.vmem [shape: bf16[1024,512], index: 3, kind: input, shape index: {}]   ;;  %s5007_s2 = inlined_call_operand.vmem [shape: f32[1,1024], index: 2, kind: input, shape index: {}]   ;;  %s5008_s5 = inlined_call_operand.vmem [shape: bf16[512,256], index: 5, kind: input, shape index: {}]   ;;  %s5009_s4 = inlined_call_operand.vmem [shape: f32[1,512], index: 4, kind: input, shape index: {}]   ;;  %s5010_s7 = inlined_call_operand.vmem [shape: bf16[256,128], index: 7, kind: input, shape index: {}]   ;;  %s5011_s6 = inlined_call_operand.vmem [shape: f32[1,256], index: 6, kind: input, shape index: {}]   ;;  %s5012_s8 = inlined_call_operand.vmem [shape: f32[1,128], index: 8, kind: input, shape index: {}]   ;;  %s5013_s9 = inlined_call_operand.vmem [shape: f32[16,128], index: 9, kind: output, shape index: {}]  }
   0x1   :  { %v35_v0 = vld [vmem:[%s5004_s1] sm:$0xff]  ;;  %166 = vmatprep.mubr.bf16.mxu0 %v3824_v2  ;;  %v36_v5 = vld [vmem:[%s5004_s1 + $0x8] sm:$0xff]  ;;  %v37_v7 = vld [vmem:[%s5004_s1 + $0x10] sm:$0xff] }
   0x2   :  { %v39_v1 = vld [vmem:[%s5004_s1 + $0x20] sm:$0xff]  ;;  %v40_v6 = vld [vmem:[%s5004_s1 + $0x28] sm:$0xff]  ;;  %v41_v8 = vld [vmem:[%s5004_s1 + $0x30] sm:$0xff] }
   0x3   :  { %v2916_v3 = vcombine.high %v35_v0, %v39_v1  ;;  %v2915_v4 = vcombine.low %v35_v0, %v39_v1  ;;  %v3327_v9 = vld [vmem:[%s5005_s0] sm:$0xff]   ;;  %v2918_v10 = vcombine.high %v36_v5, %v40_v6  ;;  %v2917_v11 = vcombine.low %v36_v5, %v40_v6  ;;  %v38_v18 = vld [vmem:[%s5004_s1 + $0x18] sm:$0xff] }
   0x4   :  { %v3328_v12 = vld [vmem:[%s5006_s3 + $0x4] ss:$16 sps:$4 sm:$0xff]   ;;  %v3330_v13 = vld [vmem:[%s5006_s3] ss:$16 sps:$4 sm:$0xff]   ;;  %v2920_v14 = vcombine.high %v37_v7, %v41_v8  ;;  %v42_v19 = vld [vmem:[%s5004_s1 + $0x38] sm:$0xff]  ;;  %v2919_v21 = vcombine.low %v37_v7, %v41_v8 }
   0x5   :  { %134 = vmatprep.subr.bf16.mxu0 %v2916_v3  ;;  %v3331_v15 = vld [vmem:[%s5006_s3 + $0x24] ss:$16 sps:$4 sm:$0xff]   ;;  %1888 = vmatprep.subr.bf16.mxu1 %v3328_v12  ;;  %v3333_v16 = vld [vmem:[%s5006_s3 + $0x20] ss:$16 sps:$4 sm:$0xff]   ;;  %v2922_v22 = vcombine.high %v38_v18, %v42_v19  ;;  %v2921_v27 = vcombine.low %v38_v18, %v42_v19 }
   0x6   :  { %135 = vmatpush1.bf16.msra.mxu0 %v2915_v4  ;;  %1889 = vmatpush1.bf16.msra.mxu1 %v3330_v13  ;;  %v3334_v17 = vld [vmem:[%s5006_s3 + $0x44] ss:$16 sps:$4 sm:$0xff]   ;;  %v3339_v20 = vld [vmem:[%s5006_s3 + $0x40] ss:$16 sps:$4 sm:$0xff]  }
   0x7   :  { %177 = vmatprep.subr.bf16.mxu0 %v2918_v10  ;;  %1890 = vmatprep.subr.bf16.mxu1 %v3331_v15  ;;  %v3340_v23 = vld [vmem:[%s5006_s3 + $0x64] ss:$16 sps:$4 sm:$0xff]   ;;  %v3345_v24 = vld [vmem:[%s5006_s3 + $0x60] ss:$16 sps:$4 sm:$0xff]   ;;  %v3423_v15 = vld [vmem:[%s5006_s3 + $0xc] ss:$16 sps:$4 sm:$0xff]  }
   0x8   :  { %v3346_v25 = vld [vmem:[%s5006_s3 + $0x84] ss:$16 sps:$4 sm:$0xff]   ;;  %v3351_v26 = vld [vmem:[%s5006_s3 + $0x80] ss:$16 sps:$4 sm:$0xff]  }
   0x9   :  { %2923 = vmatmul.mubr.msk.bf16.vlgmr.msra.gmra.mrb[0].mxu0 %vm130_vm0, %v3327_v9  ;;  %v3338_v28 = vld [vmem:[%s5006_s3 + $0x204] ss:$16 sps:$4 sm:$0xff]   ;;  %v3357_v30 = vld [vmem:[%s5006_s3 + $0xa0] ss:$16 sps:$4 sm:$0xff]  }
   0xa   :  { %178 = vmatpush1.bf16.msra.mxu0 %v2917_v11  ;;  %209 = vmatprep.mubr.bf16.mxu0 %v3824_v2  ;;  %v3352_v29 = vld [vmem:[%s5006_s3 + $0xa4] ss:$16 sps:$4 sm:$0xff]   ;;  %v3336_v32 = vld [vmem:[%s5006_s3 + $0x200] ss:$16 sps:$4 sm:$0xff]  }
   0xb   :  { %220 = vmatprep.subr.bf16.mxu0 %v2920_v14  ;;  %1891 = vmatpush1.bf16.msra.mxu1 %v3333_v16  ;;  %v3358_v31 = vld [vmem:[%s5006_s3 + $0xc4] ss:$16 sps:$4 sm:$0xff]   ;;  %v3363_v33 = vld [vmem:[%s5006_s3 + $0xc0] ss:$16 sps:$4 sm:$0xff]  }
   0xc   :  { %1892 = vmatprep.subr.bf16.mxu1 %v3334_v17  ;;  %v3364_v34 = vld [vmem:[%s5006_s3 + $0xe4] ss:$16 sps:$4 sm:$0xff]   ;;  %v3369_v36 = vld [vmem:[%s5006_s3 + $0xe0] ss:$16 sps:$4 sm:$0xff]  }
   0xd   :  { %v3344_v35 = vld [vmem:[%s5006_s3 + $0x224] ss:$16 sps:$4 sm:$0xff]   ;;  %v3342_v37 = vld [vmem:[%s5006_s3 + $0x220] ss:$16 sps:$4 sm:$0xff]  }
   0xe   :  { %v3370_v38 = vld [vmem:[%s5006_s3 + $0x104] ss:$16 sps:$4 sm:$0xff]   ;;  %v3348_v40 = vld [vmem:[%s5006_s3 + $0x240] ss:$16 sps:$4 sm:$0xff]  }
   0xf   :  { %1893 = vmatpush1.bf16.msra.mxu1 %v3339_v20  ;;  %v3350_v39 = vld [vmem:[%s5006_s3 + $0x244] ss:$16 sps:$4 sm:$0xff]   ;;  %v3375_v41 = vld [vmem:[%s5006_s3 + $0x100] ss:$16 sps:$4 sm:$0xff]   ;;  %v45_v20 = vlaneseq }
  0x10   :  { %1894 = vmatprep.subr.bf16.mxu1 %v3340_v23  ;;  %v3376_v42 = vld [vmem:[%s5006_s3 + $0x124] ss:$16 sps:$4 sm:$0xff]   ;;  %v3354_v44 = vld [vmem:[%s5006_s3 + $0x260] ss:$16 sps:$4 sm:$0xff]  }
  0x11   :  { %2924 = vmatmul.mubr.msk.bf16.vlgmr.msra.gmra.mrb[4].mxu0 %vm130_vm0, %v3327_v9  ;;  %v3356_v43 = vld [vmem:[%s5006_s3 + $0x264] ss:$16 sps:$4 sm:$0xff]   ;;  %v3381_v45 = vld [vmem:[%s5006_s3 + $0x120] ss:$16 sps:$4 sm:$0xff]  }
  0x12   :  { %221 = vmatpush1.bf16.msra.mxu0 %v2919_v21  ;;  %252 = vmatprep.mubr.bf16.mxu0 %v3824_v2  ;;  %v3382_v46 = vld [vmem:[%s5006_s3 + $0x144] ss:$16 sps:$4 sm:$0xff]   ;;  %v3387_v48 = vld [vmem:[%s5006_s3 + $0x140] ss:$16 sps:$4 sm:$0xff]   ;;  %v4104_v21 = vshrl.u32 %v45_v20, 7 }
  0x13   :  { %263 = vmatprep.subr.bf16.mxu0 %v2922_v22  ;;  %1895 = vmatpush1.bf16.msra.mxu1 %v3345_v24  ;;  %v3362_v47 = vld [vmem:[%s5006_s3 + $0x284] ss:$16 sps:$4 sm:$0xff]   ;;  %v3360_v49 = vld [vmem:[%s5006_s3 + $0x280] ss:$16 sps:$4 sm:$0xff]  }
  0x14   :  { %1896 = vmatprep.subr.bf16.mxu1 %v3346_v25  ;;  %v3388_v50 = vld [vmem:[%s5006_s3 + $0x164] ss:$16 sps:$4 sm:$0xff]   ;;  %v3393_v52 = vld [vmem:[%s5006_s3 + $0x160] ss:$16 sps:$4 sm:$0xff]   ;;  %v4107_v22 = vsub.s32 0, %v4104_v21  ;;  %v4115_v24 = vsub.s32 1, %v4104_v21 }
  0x15   :  { %v3368_v51 = vld [vmem:[%s5006_s3 + $0x2a4] ss:$16 sps:$4 sm:$0xff]   ;;  %v3366_v53 = vld [vmem:[%s5006_s3 + $0x2a0] ss:$16 sps:$4 sm:$0xff]  }
  0x16   :  { %v3394_v54 = vld [vmem:[%s5006_s3 + $0x184] ss:$16 sps:$4 sm:$0xff]   ;;  %v3399_v56 = vld [vmem:[%s5006_s3 + $0x180] ss:$16 sps:$4 sm:$0xff]  }
  0x17   :  { %1897 = vmatpush1.bf16.msra.mxu1 %v3351_v26  ;;  %v3374_v55 = vld [vmem:[%s5006_s3 + $0x2c4] ss:$16 sps:$4 sm:$0xff]   ;;  %v3372_v57 = vld [vmem:[%s5006_s3 + $0x2c0] ss:$16 sps:$4 sm:$0xff]  }
  0x18   :  { %1898 = vmatprep.subr.bf16.mxu1 %v3352_v29  ;;  %v3400_v58 = vld [vmem:[%s5006_s3 + $0x1a4] ss:$16 sps:$4 sm:$0xff]   ;;  %v3405_v60 = vld [vmem:[%s5006_s3 + $0x1a0] ss:$16 sps:$4 sm:$0xff]  }
  0x19   :  { %2925 = vmatmul.mubr.msk.bf16.vlgmr.msra.gmra.mrb[8].mxu0 %vm130_vm0, %v3327_v9  ;;  %v3380_v59 = vld [vmem:[%s5006_s3 + $0x2e4] ss:$16 sps:$4 sm:$0xff]   ;;  %v3378_v61 = vld [vmem:[%s5006_s3 + $0x2e0] ss:$16 sps:$4 sm:$0xff]  }
  0x1a   :  { %264 = vmatpush1.bf16.msra.mxu0 %v2921_v27  ;;  %295 = vmatprep.mubr.bf16.mxu0 %v3824_v2  ;;  %v3386_v62 = vld [vmem:[%s5006_s3 + $0x304] ss:$16 sps:$4 sm:$0xff]   ;;  %v3384_v63 = vld [vmem:[%s5006_s3 + $0x300] ss:$16 sps:$4 sm:$0xff]  }
  0x1b   :  { %1931 = vmatprep.subr.bf16.mxu0 %v3338_v28  ;;  %1899 = vmatpush1.bf16.msra.mxu1 %v3357_v30  ;;  %v3392_v0 = vld [vmem:[%s5006_s3 + $0x324] ss:$16 sps:$4 sm:$0xff]   ;;  %v3390_v1 = vld [vmem:[%s5006_s3 + $0x320] ss:$16 sps:$4 sm:$0xff]   ;;  %v55_v30 = vsub.s32 2, %v4104_v21 }
  0x1c   :  { %1900 = vmatprep.subr.bf16.mxu1 %v3358_v31  ;;  %v3398_v2 = vld [vmem:[%s5006_s3 + $0x344] ss:$16 sps:$4 sm:$0xff]   ;;  %v3396_v3 = vld [vmem:[%s5006_s3 + $0x340] ss:$16 sps:$4 sm:$0xff]  }
  0x1d   :  { %v3404_v4 = vld [vmem:[%s5006_s3 + $0x364] ss:$16 sps:$4 sm:$0xff]   ;;  %v3402_v5 = vld [vmem:[%s5006_s3 + $0x360] ss:$16 sps:$4 sm:$0xff]  }
  0x1e   :  { %v3406_v6 = vld [vmem:[%s5006_s3 + $0x1c4] ss:$16 sps:$4 sm:$0xff]   ;;  %v3408_v8 = vld [vmem:[%s5006_s3 + $0x380] ss:$16 sps:$4 sm:$0xff]  }
  0x1f   :  { %1901 = vmatpush1.bf16.msra.mxu1 %v3363_v33  ;;  %v3410_v7 = vld [vmem:[%s5006_s3 + $0x384] ss:$16 sps:$4 sm:$0xff]   ;;  %v3414_v12 = vld [vmem:[%s5006_s3 + $0x3a0] ss:$16 sps:$4 sm:$0xff]   ;;  %v59_v33 = vsub.s32 3, %v4104_v21 }
  0x20   :  { %1902 = vmatprep.subr.bf16.mxu1 %v3364_v34  ;;  %v3412_v10 = vld [vmem:[%s5006_s3 + $0x1e4] ss:$16 sps:$4 sm:$0xff]   ;;  %v3417_v13 = vld [vmem:[%s5006_s3 + $0x1e0] ss:$16 sps:$4 sm:$0xff]  }
  0x21   :  { %2926 = vmatmul.mubr.msk.bf16.vlgmr.msra.gmra.mrb[12].mxu0 %vm130_vm0, %v3327_v9  ;;  %v3411_v9 = vld [vmem:[%s5006_s3 + $0x1c0] ss:$16 sps:$4 sm:$0xff]   ;;  %v3416_v11 = vld [vmem:[%s5006_s3 + $0x3a4] ss:$16 sps:$4 sm:$0xff]  }
  0x22   :  { %1932 = vmatpush1.bf16.msra.mxu0 %v3336_v32  ;;  %v3420_v14 = vld [vmem:[%s5006_s3 + $0x3c4] ss:$16 sps:$4 sm:$0xff]   ;;  %v3418_v16 = vld [vmem:[%s5006_s3 + $0x3c0] ss:$16 sps:$4 sm:$0xff]  }
  0x23   :  { %1933 = vmatprep.subr.bf16.mxu0 %v3344_v35  ;;  %1903 = vmatpush1.bf16.msra.mxu1 %v3369_v36  ;;  %v3426_v17 = vld [vmem:[%s5006_s3 + $0x3e4] ss:$16 sps:$4 sm:$0xff]   ;;  %v3424_v18 = vld [vmem:[%s5006_s3 + $0x3e0] ss:$16 sps:$4 sm:$0xff]  }
  0x24   :  { %1904 = vmatprep.subr.bf16.mxu1 %v3370_v38  ;;  %v3432_v19 = vld [vmem:[%s5006_s3 + $0x404] ss:$16 sps:$4 sm:$0xff]  }
  0x25   :  { %v4112_v23 = vld [vmem:[%s5007_s2] sm:$0xff] }
  0x26   :  { %1934 = vmatpush1.bf16.msra.mxu0 %v3342_v37  ;;  %v48_v25 = vrot.slane %v4112_v23, %v4107_v22  ;;  %v52_v26 = vrot.slane %v4112_v23, %v4115_v24 }
  0x27   :  { %1935 = vmatprep.subr.bf16.mxu0 %v3350_v39  ;;  %1905 = vmatpush1.bf16.msra.mxu1 %v3375_v41  ;;  %v56_v39 = vrot.slane %v4112_v23, %v55_v30 }
  0x28   :  { %1906 = vmatprep.subr.bf16.mxu1 %v3376_v42  ;;  %v60_v42 = vrot.slane %v4112_v23, %v59_v33 }
  0x2a   :  { %1936 = vmatpush1.bf16.msra.mxu0 %v3348_v40 }
  0x2b   :  { %1937 = vmatprep.subr.bf16.mxu0 %v3356_v43  ;;  %1907 = vmatpush1.bf16.msra.mxu1 %v3381_v45 }
  0x2c   :  { %1908 = vmatprep.subr.bf16.mxu1 %v3382_v46  ;;  %v3421_v46 = vld [vmem:[%s5006_s3 + $0x8] ss:$16 sps:$4 sm:$0xff]  }
  0x2e   :  { %1938 = vmatpush1.bf16.msra.mxu0 %v3354_v44 }
  0x2f   :  { %1939 = vmatprep.subr.bf16.mxu0 %v3362_v47  ;;  %1909 = vmatpush1.bf16.msra.mxu1 %v3387_v48 }
  0x30   :  { %1910 = vmatprep.subr.bf16.mxu1 %v3388_v50  ;;  %v63_v50 = vsub.s32 4, %v4104_v21 }
  0x32   :  { %1940 = vmatpush1.bf16.msra.mxu0 %v3360_v49  ;;  %v3429_v49 = vld [vmem:[%s5006_s3 + $0x2c] ss:$16 sps:$4 sm:$0xff]  }
  0x33   :  { %1941 = vmatprep.subr.bf16.mxu0 %v3368_v51  ;;  %1911 = vmatpush1.bf16.msra.mxu1 %v3393_v52 }
  0x34   :  { %1912 = vmatprep.subr.bf16.mxu1 %v3394_v54 }
  0x36   :  { %1942 = vmatpush1.bf16.msra.mxu0 %v3366_v53  ;;  %v67_v53 = vsub.s32 5, %v4104_v21 }
  0x37   :  { %1943 = vmatprep.subr.bf16.mxu0 %v3374_v55  ;;  %1913 = vmatpush1.bf16.msra.mxu1 %v3399_v56 }
  0x38   :  { %1914 = vmatprep.subr.bf16.mxu1 %v3400_v58 }
  0x3a   :  { %1944 = vmatpush1.bf16.msra.mxu0 %v3372_v57 }
  0x3b   :  { %1945 = vmatprep.subr.bf16.mxu0 %v3380_v59  ;;  %1915 = vmatpush1.bf16.msra.mxu1 %v3405_v60  ;;  %v3427_v59 = vld [vmem:[%s5006_s3 + $0x28] ss:$16 sps:$4 sm:$0xff]  }
  0x3c   :  { %1916 = vmatprep.subr.bf16.mxu1 %v3406_v6  ;;  %v3438_v6 = vld [vmem:[%s5006_s3 + $0x424] ss:$16 sps:$4 sm:$0xff]  }
  0x3e   :  { %1946 = vmatpush1.bf16.msra.mxu0 %v3378_v61  ;;  %v3435_v61 = vld [vmem:[%s5006_s3 + $0x4c] ss:$16 sps:$4 sm:$0xff]  }
  0x3f   :  { %1947 = vmatprep.subr.bf16.mxu0 %v3386_v62  ;;  %1917 = vmatpush1.bf16.msra.mxu1 %v3411_v9  ;;  %v64_v62 = vrot.slane %v4112_v23, %v63_v50 }
  0x40   :  { %1918 = vmatprep.subr.bf16.mxu1 %v3412_v10  ;;  %v71_v10 = vsub.s32 6, %v4104_v21 }
  0x42   :  { %1948 = vmatpush1.bf16.msra.mxu0 %v3384_v63 }
  0x43   :  { %1949 = vmatprep.subr.bf16.mxu0 %v3392_v0  ;;  %1919 = vmatpush1.bf16.msra.mxu1 %v3417_v13  ;;  %v68_v0 = vrot.slane %v4112_v23, %v67_v53  ;;  %v75_v13 = vsub.s32 7, %v4104_v21  ;;  %v3819_v21 = vld [vmem:[%s5010_s7 + $0x28] sm:$0xff]  }
  0x44   :  { %2060 = vmatprep.subr.bf16.mxu1 %v3423_v15 }
  0x46   :  { %1950 = vmatpush1.bf16.msra.mxu0 %v3390_v1 }
  0x47   :  { %1951 = vmatprep.subr.bf16.mxu0 %v3398_v2 }
  0x4a   :  { %1952 = vmatpush1.bf16.msra.mxu0 %v3396_v3  ;;  %v3430_v3 = vld [vmem:[%s5006_s3 + $0x400] ss:$16 sps:$4 sm:$0xff]  }
  0x4b   :  { %1953 = vmatprep.subr.bf16.mxu0 %v3404_v4  ;;  %v3433_v4 = vld [vmem:[%s5006_s3 + $0x48] ss:$16 sps:$4 sm:$0xff]  }
  0x4e   :  { %1954 = vmatpush1.bf16.msra.mxu0 %v3402_v5 }
  0x4f   :  { %1955 = vmatprep.subr.bf16.mxu0 %v3410_v7  ;;  %v3441_v7 = vld [vmem:[%s5006_s3 + $0x6c] ss:$16 sps:$4 sm:$0xff]  }
  0x52   :  { %1956 = vmatpush1.bf16.msra.mxu0 %v3408_v8 }
  0x53   :  { %1957 = vmatprep.subr.bf16.mxu0 %v3416_v11 }
  0x56   :  { %1958 = vmatpush1.bf16.msra.mxu0 %v3414_v12 }
  0x57   :  { %1959 = vmatprep.subr.bf16.mxu0 %v3420_v14 }
  0x5a   :  { %1960 = vmatpush1.bf16.msra.mxu0 %v3418_v16 }
  0x5b   :  { %1961 = vmatprep.subr.bf16.mxu0 %v3426_v17  ;;  %v3436_v17 = vld [vmem:[%s5006_s3 + $0x420] ss:$16 sps:$4 sm:$0xff]  }
  0x5e   :  { %1962 = vmatpush1.bf16.msra.mxu0 %v3424_v18  ;;  %v3439_v18 = vld [vmem:[%s5006_s3 + $0x68] ss:$16 sps:$4 sm:$0xff]  }
  0x5f   :  { %1974 = vmatprep.subr.bf16.mxu0 %v3432_v19 }
  0xdc   :  { %v168_v27 = vpop.f32.mrb[0].mxu0 }
  0xdd   :  { %v169_v28 = vadd.f32 %v168_v27, %v48_v25  ;;  %v170_v29 = vpop.f32.mrb[1].mxu0 }
  0xde   :  { %v171_v31 = vadd.f32 %v170_v29, %v52_v26  ;;  %v172_v32 = vpop.f32.mrb[2].mxu0 }
  0xdf   :  { %v173_v34 = vadd.f32 %v172_v32, %v48_v25  ;;  %v174_v35 = vpop.f32.mrb[3].mxu0  ;;  %v306_v37 = vmax.f32 %v169_v28, 0.0  ;;  %v3444_v25 = vld [vmem:[%s5006_s3 + $0x444] ss:$16 sps:$4 sm:$0xff]   ;;  %v72_v28 = vrot.slane %v4112_v23, %v71_v10  ;;  %v3483_v10 = vld [vmem:[%s5006_s3 + $0x14c] ss:$16 sps:$4 sm:$0xff]  }
  0xe0   :  { %v175_v36 = vadd.f32 %v174_v35, %v52_v26  ;;  %v307_v40 = vmax.f32 %v171_v31, 0.0  ;;  %v3447_v26 = vld [vmem:[%s5006_s3 + $0x8c] ss:$16 sps:$4 sm:$0xff]   ;;  %v76_v31 = vrot.slane %v4112_v23, %v75_v13  ;;  %v3445_v35 = vld [vmem:[%s5006_s3 + $0x88] ss:$16 sps:$4 sm:$0xff]  }
  0xe1   :  { %v314_v38 = vmax.f32 %v173_v34, 0.0  ;;  %v3442_v34 = vld [vmem:[%s5006_s3 + $0x440] ss:$16 sps:$4 sm:$0xff]   ;;  %v3450_v23 = vld [vmem:[%s5006_s3 + $0x464] ss:$16 sps:$4 sm:$0xff]  }
  0xe2   :  { %v315_v41 = vmax.f32 %v175_v36, 0.0  ;;  %v3486_v13 = vld [vmem:[%s5006_s3 + $0x524] ss:$16 sps:$4 sm:$0xff]  }
  0xe3   :  { %v4129_v43 = vpack.c.bf16 %v314_v38, %v306_v37  ;;  %v3453_v38 = vld [vmem:[%s5006_s3 + $0xac] ss:$16 sps:$4 sm:$0xff]  }
  0xe4   :  { %v211_v44 = vpop.f32.mrb[4].mxu0  ;;  %v323_v45 = vpack.c.bf16 %v315_v41, %v307_v40 }
  0xe5   :  { %v212_v47 = vadd.f32 %v211_v44, %v56_v39  ;;  %v213_v48 = vpop.f32.mrb[5].mxu0 }
  0xe6   :  { %v214_v51 = vadd.f32 %v213_v48, %v60_v42  ;;  %v215_v52 = vpop.f32.mrb[6].mxu0  ;;  %1920 = vmatprep.mubr.bf16.mxu1 %v323_v45  ;;  %v3451_v48 = vld [vmem:[%s5006_s3 + $0xa8] ss:$16 sps:$4 sm:$0xff]  }
  0xe7   :  { %v308_v54 = vmax.f32 %v212_v47, 0.0  ;;  %v216_v55 = vadd.f32 %v215_v52, %v56_v39  ;;  %v217_v56 = vpop.f32.mrb[7].mxu0  ;;  %1921 = vmatmul.mubr.bf16.vlgmr.msra.gmra.mrb[0].mxu1 %v4129_v43  ;;  %v3448_v47 = vld [vmem:[%s5006_s3 + $0x460] ss:$16 sps:$4 sm:$0xff]   ;;  %v3459_v52 = vld [vmem:[%s5006_s3 + $0xcc] ss:$16 sps:$4 sm:$0xff]  }
  0xe8   :  { %v309_v57 = vmax.f32 %v214_v51, 0.0  ;;  %v218_v58 = vadd.f32 %v217_v56, %v60_v42  ;;  %2061 = vmatpush1.bf16.msra.mxu1 %v3421_v46  ;;  %2092 = vmatprep.mubr.bf16.mxu1 %v323_v45  ;;  %v3456_v51 = vld [vmem:[%s5006_s3 + $0x484] ss:$16 sps:$4 sm:$0xff]   ;;  %v3454_v56 = vld [vmem:[%s5006_s3 + $0x480] ss:$16 sps:$4 sm:$0xff]  }
  0xe9   :  { %v316_v60 = vmax.f32 %v216_v55, 0.0  ;;  %2062 = vmatprep.subr.bf16.mxu1 %v3429_v49 }
  0xea   :  { %v317_v63 = vmax.f32 %v218_v58, 0.0 }
  0xeb   :  { %v4148_v1 = vpack.c.bf16 %v316_v60, %v308_v54  ;;  %v3465_v60 = vld [vmem:[%s5006_s3 + $0xec] ss:$16 sps:$4 sm:$0xff]  }
  0xec   :  { %v4150_v2 = vpack.c.bf16 %v317_v63, %v309_v57  ;;  %2063 = vmatpush1.bf16.msra.mxu1 %v3427_v59  ;;  %v254_v5 = vpop.f32.mrb[8].mxu0  ;;  %v3457_v57 = vld [vmem:[%s5006_s3 + $0xc8] ss:$16 sps:$4 sm:$0xff]   ;;  %v3462_v59 = vld [vmem:[%s5006_s3 + $0x4a4] ss:$16 sps:$4 sm:$0xff]  }
  0xed   :  { %2064 = vmatprep.subr.bf16.mxu1 %v3435_v61  ;;  %v255_v8 = vadd.f32 %v254_v5, %v64_v62  ;;  %v256_v9 = vpop.f32.mrb[9].mxu0  ;;  %v3460_v61 = vld [vmem:[%s5006_s3 + $0x4a0] ss:$16 sps:$4 sm:$0xff]   ;;  %v3468_v63 = vld [vmem:[%s5006_s3 + $0x4c4] ss:$16 sps:$4 sm:$0xff]  }
  0xee   :  { %1963 = vmatprep.mubr.bf16.mxu0 %v4150_v2  ;;  %v257_v11 = vadd.f32 %v256_v9, %v68_v0  ;;  %v258_v12 = vpop.f32.mrb[10].mxu0  ;;  %v3474_v5 = vld [vmem:[%s5006_s3 + $0x4e4] ss:$16 sps:$4 sm:$0xff]  }
  0xef   :  { %1964 = vmatmul.mubr.bf16.vlgmr.msra.gmra.mrb[16].mxu0 %v4148_v1  ;;  %v310_v14 = vmax.f32 %v255_v8, 0.0  ;;  %v259_v15 = vadd.f32 %v258_v12, %v64_v62  ;;  %v260_v16 = vpop.f32.mrb[11].mxu0  ;;  %v3463_v62 = vld [vmem:[%s5006_s3 + $0xe8] ss:$16 sps:$4 sm:$0xff]   ;;  %v3480_v9 = vld [vmem:[%s5006_s3 + $0x504] ss:$16 sps:$4 sm:$0xff]  }
  0xf0   :  { %1975 = vmatpush1.bf16.msra.mxu0 %v3430_v3  ;;  %2065 = vmatpush1.bf16.msra.mxu1 %v3433_v4  ;;  %v311_v19 = vmax.f32 %v257_v11, 0.0  ;;  %v261_v20 = vadd.f32 %v260_v16, %v68_v0  ;;  %v3471_v0 = vld [vmem:[%s5006_s3 + $0x10c] ss:$16 sps:$4 sm:$0xff]   ;;  %v3466_v3 = vld [vmem:[%s5006_s3 + $0x4c0] ss:$16 sps:$4 sm:$0xff]  }
  0xf1   :  { %1976 = vmatprep.subr.bf16.mxu0 %v3438_v6  ;;  %2066 = vmatprep.subr.bf16.mxu1 %v3441_v7  ;;  %v318_v27 = vmax.f32 %v259_v15, 0.0  ;;  %v3469_v4 = vld [vmem:[%s5006_s3 + $0x108] ss:$16 sps:$4 sm:$0xff]   ;;  %v3477_v6 = vld [vmem:[%s5006_s3 + $0x12c] ss:$16 sps:$4 sm:$0xff]  }
  0xf2   :  { %v319_v29 = vmax.f32 %v261_v20, 0.0  ;;  %v3472_v7 = vld [vmem:[%s5006_s3 + $0x4e0] ss:$16 sps:$4 sm:$0xff]   ;;  %v3475_v8 = vld [vmem:[%s5006_s3 + $0x128] ss:$16 sps:$4 sm:$0xff]  }
  0xf3   :  { %v4182_v32 = vpack.c.bf16 %v318_v27, %v310_v14  ;;  %v3478_v11 = vld [vmem:[%s5006_s3 + $0x500] ss:$16 sps:$4 sm:$0xff]   ;;  %v3481_v12 = vld [vmem:[%s5006_s3 + $0x148] ss:$16 sps:$4 sm:$0xff]   ;;  %v3489_v14 = vld [vmem:[%s5006_s3 + $0x16c] ss:$16 sps:$4 sm:$0xff]  }
  0xf4   :  { %1977 = vmatpush1.bf16.msra.mxu0 %v3436_v17  ;;  %2067 = vmatpush1.bf16.msra.mxu1 %v3439_v18  ;;  %v4190_v36 = vpack.c.bf16 %v319_v29, %v311_v19  ;;  %v297_v37 = vpop.f32.mrb[12].mxu0  ;;  %v3484_v15 = vld [vmem:[%s5006_s3 + $0x520] ss:$16 sps:$4 sm:$0xff]   ;;  %v3487_v16 = vld [vmem:[%s5006_s3 + $0x168] ss:$16 sps:$4 sm:$0xff]  }
  0xf5   :  { %1978 = vmatprep.subr.bf16.mxu0 %v3444_v25  ;;  %2068 = vmatprep.subr.bf16.mxu1 %v3447_v26  ;;  %v298_v39 = vadd.f32 %v297_v37, %v72_v28  ;;  %v299_v40 = vpop.f32.mrb[13].mxu0  ;;  %v3492_v17 = vld [vmem:[%s5006_s3 + $0x544] ss:$16 sps:$4 sm:$0xff]   ;;  %v3495_v18 = vld [vmem:[%s5006_s3 + $0x18c] ss:$16 sps:$4 sm:$0xff]  }
  0xf6   :  { %2006 = vmatprep.mubr.bf16.mxu0 %v4190_v36  ;;  %v300_v41 = vadd.f32 %v299_v40, %v76_v31  ;;  %v301_v42 = vpop.f32.mrb[14].mxu0  ;;  %v3490_v19 = vld [vmem:[%s5006_s3 + $0x540] ss:$16 sps:$4 sm:$0xff]   ;;  %v3493_v20 = vld [vmem:[%s5006_s3 + $0x188] ss:$16 sps:$4 sm:$0xff]  }
  0xf7   :  { %v312_v44 = vmax.f32 %v298_v39, 0.0  ;;  %v302_v45 = vadd.f32 %v301_v42, %v72_v28  ;;  %v303_v46 = vpop.f32.mrb[15].mxu0  ;;  %v3498_v25 = vld [vmem:[%s5006_s3 + $0x564] ss:$16 sps:$4 sm:$0xff]   ;;  %v3501_v26 = vld [vmem:[%s5006_s3 + $0x1ac] ss:$16 sps:$4 sm:$0xff]  }
  0xf8   :  { %1979 = vmatpush1.bf16.msra.mxu0 %v3442_v34  ;;  %2069 = vmatpush1.bf16.msra.mxu1 %v3445_v35  ;;  %v313_v49 = vmax.f32 %v300_v41, 0.0  ;;  %v304_v50 = vadd.f32 %v303_v46, %v76_v31  ;;  %v3496_v27 = vld [vmem:[%s5006_s3 + $0x560] ss:$16 sps:$4 sm:$0xff]   ;;  %v3499_v28 = vld [vmem:[%s5006_s3 + $0x1a8] ss:$16 sps:$4 sm:$0xff]  }
  0xf9   :  { %1980 = vmatprep.subr.bf16.mxu0 %v3450_v23  ;;  %2070 = vmatprep.subr.bf16.mxu1 %v3453_v38  ;;  %v320_v53 = vmax.f32 %v302_v45, 0.0  ;;  %v3504_v29 = vld [vmem:[%s5006_s3 + $0x584] ss:$16 sps:$4 sm:$0xff]   ;;  %v3507_v31 = vld [vmem:[%s5006_s3 + $0x1cc] ss:$16 sps:$4 sm:$0xff]  }
  0xfa   :  { %v321_v54 = vmax.f32 %v304_v50, 0.0  ;;  %v3502_v34 = vld [vmem:[%s5006_s3 + $0x580] ss:$16 sps:$4 sm:$0xff]   ;;  %v3505_v35 = vld [vmem:[%s5006_s3 + $0x1c8] ss:$16 sps:$4 sm:$0xff]  }
  0xfb   :  { %v4211_v55 = vpack.c.bf16 %v320_v53, %v312_v44  ;;  %v3510_v37 = vld [vmem:[%s5006_s3 + $0x5a4] ss:$16 sps:$4 sm:$0xff]   ;;  %v3513_v23 = vld [vmem:[%s5006_s3 + $0x1ec] ss:$16 sps:$4 sm:$0xff]   ;;  %v3508_v38 = vld [vmem:[%s5006_s3 + $0x5a0] ss:$16 sps:$4 sm:$0xff]  }
  0xfc   :  { %1981 = vmatpush1.bf16.msra.mxu0 %v3448_v47  ;;  %2071 = vmatpush1.bf16.msra.mxu1 %v3451_v48  ;;  %v4219_v58 = vpack.c.bf16 %v321_v54, %v313_v49  ;;  %v3511_v39 = vld [vmem:[%s5006_s3 + $0x1e8] ss:$16 sps:$4 sm:$0xff]   ;;  %v3516_v40 = vld [vmem:[%s5006_s3 + $0x5c4] ss:$16 sps:$4 sm:$0xff]   ;;  %v3519_v41 = vld [vmem:[%s5006_s3 + $0x20c] ss:$16 sps:$4 sm:$0xff]  }
  0xfd   :  { %1982 = vmatprep.subr.bf16.mxu0 %v3456_v51  ;;  %2072 = vmatprep.subr.bf16.mxu1 %v3459_v52  ;;  %v3514_v42 = vld [vmem:[%s5006_s3 + $0x5c0] ss:$16 sps:$4 sm:$0xff]   ;;  %v3517_v44 = vld [vmem:[%s5006_s3 + $0x208] ss:$16 sps:$4 sm:$0xff]   ;;  %v3522_v45 = vld [vmem:[%s5006_s3 + $0x5e4] ss:$16 sps:$4 sm:$0xff]  }
  0xfe   :  { %v3525_v46 = vld [vmem:[%s5006_s3 + $0x22c] ss:$16 sps:$4 sm:$0xff]   ;;  %v3520_v47 = vld [vmem:[%s5006_s3 + $0x5e0] ss:$16 sps:$4 sm:$0xff]   ;;  %v3523_v48 = vld [vmem:[%s5006_s3 + $0x228] ss:$16 sps:$4 sm:$0xff]  }
  0xff   :  { %v3528_v49 = vld [vmem:[%s5006_s3 + $0x604] ss:$16 sps:$4 sm:$0xff]   ;;  %v3526_v50 = vld [vmem:[%s5006_s3 + $0x600] ss:$16 sps:$4 sm:$0xff]   ;;  %v3537_v52 = vld [vmem:[%s5006_s3 + $0x26c] ss:$16 sps:$4 sm:$0xff]  }
 0x100   :  { %1983 = vmatpush1.bf16.msra.mxu0 %v3454_v56  ;;  %2073 = vmatpush1.bf16.msra.mxu1 %v3457_v57  ;;  %v3534_v51 = vld [vmem:[%s5006_s3 + $0x624] ss:$16 sps:$4 sm:$0xff]   ;;  %v3532_v53 = vld [vmem:[%s5006_s3 + $0x620] ss:$16 sps:$4 sm:$0xff]   ;;  %v3535_v54 = vld [vmem:[%s5006_s3 + $0x268] ss:$16 sps:$4 sm:$0xff]  }
 0x101   :  { %1984 = vmatprep.subr.bf16.mxu0 %v3462_v59  ;;  %2074 = vmatprep.subr.bf16.mxu1 %v3465_v60  ;;  %v3540_v56 = vld [vmem:[%s5006_s3 + $0x644] ss:$16 sps:$4 sm:$0xff]   ;;  %v3543_v57 = vld [vmem:[%s5006_s3 + $0x28c] ss:$16 sps:$4 sm:$0xff]   ;;  %v3538_v59 = vld [vmem:[%s5006_s3 + $0x640] ss:$16 sps:$4 sm:$0xff]  }
 0x102   :  { %v3541_v60 = vld [vmem:[%s5006_s3 + $0x288] ss:$16 sps:$4 sm:$0xff]  }
 0x104   :  { %1985 = vmatpush1.bf16.msra.mxu0 %v3460_v61  ;;  %2075 = vmatpush1.bf16.msra.mxu1 %v3463_v62  ;;  %v3546_v61 = vld [vmem:[%s5006_s3 + $0x664] ss:$16 sps:$4 sm:$0xff]   ;;  %v3549_v62 = vld [vmem:[%s5006_s3 + $0x2ac] ss:$16 sps:$4 sm:$0xff]  }
 0x105   :  { %1986 = vmatprep.subr.bf16.mxu0 %v3468_v63  ;;  %2076 = vmatprep.subr.bf16.mxu1 %v3471_v0  ;;  %v3544_v63 = vld [vmem:[%s5006_s3 + $0x660] ss:$16 sps:$4 sm:$0xff]   ;;  %v3547_v0 = vld [vmem:[%s5006_s3 + $0x2a8] ss:$16 sps:$4 sm:$0xff]  }
 0x108   :  { %1987 = vmatpush1.bf16.msra.mxu0 %v3466_v3  ;;  %2077 = vmatpush1.bf16.msra.mxu1 %v3469_v4  ;;  %v3552_v3 = vld [vmem:[%s5006_s3 + $0x684] ss:$16 sps:$4 sm:$0xff]   ;;  %v3555_v4 = vld [vmem:[%s5006_s3 + $0x2cc] ss:$16 sps:$4 sm:$0xff]  }
 0x109   :  { %1988 = vmatprep.subr.bf16.mxu0 %v3474_v5  ;;  %2078 = vmatprep.subr.bf16.mxu1 %v3477_v6  ;;  %v3550_v5 = vld [vmem:[%s5006_s3 + $0x680] ss:$16 sps:$4 sm:$0xff]   ;;  %v3553_v6 = vld [vmem:[%s5006_s3 + $0x2c8] ss:$16 sps:$4 sm:$0xff]  }
 0x10c   :  { %1989 = vmatpush1.bf16.msra.mxu0 %v3472_v7  ;;  %2079 = vmatpush1.bf16.msra.mxu1 %v3475_v8  ;;  %v3558_v7 = vld [vmem:[%s5006_s3 + $0x6a4] ss:$16 sps:$4 sm:$0xff]   ;;  %v3561_v8 = vld [vmem:[%s5006_s3 + $0x2ec] ss:$16 sps:$4 sm:$0xff]  }
 0x10d   :  { %1990 = vmatprep.subr.bf16.mxu0 %v3480_v9  ;;  %2080 = vmatprep.subr.bf16.mxu1 %v3483_v10  ;;  %v3556_v9 = vld [vmem:[%s5006_s3 + $0x6a0] ss:$16 sps:$4 sm:$0xff]   ;;  %v3559_v10 = vld [vmem:[%s5006_s3 + $0x2e8] ss:$16 sps:$4 sm:$0xff]  }
 0x110   :  { %1991 = vmatpush1.bf16.msra.mxu0 %v3478_v11  ;;  %2081 = vmatpush1.bf16.msra.mxu1 %v3481_v12  ;;  %v3564_v11 = vld [vmem:[%s5006_s3 + $0x6c4] ss:$16 sps:$4 sm:$0xff]   ;;  %v3567_v12 = vld [vmem:[%s5006_s3 + $0x30c] ss:$16 sps:$4 sm:$0xff]  }
 0x111   :  { %1992 = vmatprep.subr.bf16.mxu0 %v3486_v13  ;;  %2082 = vmatprep.subr.bf16.mxu1 %v3489_v14  ;;  %v3562_v13 = vld [vmem:[%s5006_s3 + $0x6c0] ss:$16 sps:$4 sm:$0xff]   ;;  %v3565_v14 = vld [vmem:[%s5006_s3 + $0x308] ss:$16 sps:$4 sm:$0xff]  }
 0x114   :  { %1993 = vmatpush1.bf16.msra.mxu0 %v3484_v15  ;;  %2083 = vmatpush1.bf16.msra.mxu1 %v3487_v16  ;;  %v3570_v15 = vld [vmem:[%s5006_s3 + $0x6e4] ss:$16 sps:$4 sm:$0xff]   ;;  %v3573_v16 = vld [vmem:[%s5006_s3 + $0x32c] ss:$16 sps:$4 sm:$0xff]  }
 0x115   :  { %1994 = vmatprep.subr.bf16.mxu0 %v3492_v17  ;;  %2084 = vmatprep.subr.bf16.mxu1 %v3495_v18  ;;  %v3568_v17 = vld [vmem:[%s5006_s3 + $0x6e0] ss:$16 sps:$4 sm:$0xff]   ;;  %v3571_v18 = vld [vmem:[%s5006_s3 + $0x328] ss:$16 sps:$4 sm:$0xff]  }
 0x118   :  { %1995 = vmatpush1.bf16.msra.mxu0 %v3490_v19  ;;  %2085 = vmatpush1.bf16.msra.mxu1 %v3493_v20  ;;  %v3576_v19 = vld [vmem:[%s5006_s3 + $0x704] ss:$16 sps:$4 sm:$0xff]   ;;  %v3579_v20 = vld [vmem:[%s5006_s3 + $0x34c] ss:$16 sps:$4 sm:$0xff]  }
 0x119   :  { %1996 = vmatprep.subr.bf16.mxu0 %v3498_v25  ;;  %2086 = vmatprep.subr.bf16.mxu1 %v3501_v26  ;;  %v3574_v25 = vld [vmem:[%s5006_s3 + $0x700] ss:$16 sps:$4 sm:$0xff]   ;;  %v3577_v26 = vld [vmem:[%s5006_s3 + $0x348] ss:$16 sps:$4 sm:$0xff]  }
 0x11c   :  { %1997 = vmatpush1.bf16.msra.mxu0 %v3496_v27  ;;  %2087 = vmatpush1.bf16.msra.mxu1 %v3499_v28  ;;  %v3582_v27 = vld [vmem:[%s5006_s3 + $0x724] ss:$16 sps:$4 sm:$0xff]   ;;  %v3585_v28 = vld [vmem:[%s5006_s3 + $0x36c] ss:$16 sps:$4 sm:$0xff]  }
 0x11d   :  { %1998 = vmatprep.subr.bf16.mxu0 %v3504_v29  ;;  %2088 = vmatprep.subr.bf16.mxu1 %v3507_v31  ;;  %v3580_v29 = vld [vmem:[%s5006_s3 + $0x720] ss:$16 sps:$4 sm:$0xff]   ;;  %v3583_v31 = vld [vmem:[%s5006_s3 + $0x368] ss:$16 sps:$4 sm:$0xff]  }
 0x120   :  { %1999 = vmatpush1.bf16.msra.mxu0 %v3502_v34  ;;  %2089 = vmatpush1.bf16.msra.mxu1 %v3505_v35  ;;  %v3588_v34 = vld [vmem:[%s5006_s3 + $0x744] ss:$16 sps:$4 sm:$0xff]   ;;  %v3591_v35 = vld [vmem:[%s5006_s3 + $0x38c] ss:$16 sps:$4 sm:$0xff]  }
 0x121   :  { %2000 = vmatprep.subr.bf16.mxu0 %v3510_v37  ;;  %2090 = vmatprep.subr.bf16.mxu1 %v3513_v23  ;;  %v3586_v37 = vld [vmem:[%s5006_s3 + $0x740] ss:$16 sps:$4 sm:$0xff]   ;;  %v3589_v23 = vld [vmem:[%s5006_s3 + $0x388] ss:$16 sps:$4 sm:$0xff]  }
 0x124   :  { %2001 = vmatpush1.bf16.msra.mxu0 %v3508_v38  ;;  %2091 = vmatpush1.bf16.msra.mxu1 %v3511_v39  ;;  %v3594_v38 = vld [vmem:[%s5006_s3 + $0x764] ss:$16 sps:$4 sm:$0xff]   ;;  %v3597_v39 = vld [vmem:[%s5006_s3 + $0x3ac] ss:$16 sps:$4 sm:$0xff]  }
 0x125   :  { %2002 = vmatprep.subr.bf16.mxu0 %v3516_v40  ;;  %2103 = vmatprep.subr.bf16.mxu1 %v3519_v41  ;;  %v3592_v40 = vld [vmem:[%s5006_s3 + $0x760] ss:$16 sps:$4 sm:$0xff]   ;;  %v3595_v41 = vld [vmem:[%s5006_s3 + $0x3a8] ss:$16 sps:$4 sm:$0xff]  }
 0x127   :  { %2093 = vmatmul.mubr.bf16.vlgmr.msra.gmra.mrb[4].mxu1 %v4129_v43  ;;  %v3531_v43 = vld [vmem:[%s5006_s3 + $0x24c] ss:$16 sps:$4 sm:$0xff]  }
 0x128   :  { %2003 = vmatpush1.bf16.msra.mxu0 %v3514_v42  ;;  %2104 = vmatpush1.bf16.msra.mxu1 %v3517_v44  ;;  %v3600_v42 = vld [vmem:[%s5006_s3 + $0x784] ss:$16 sps:$4 sm:$0xff]   ;;  %v3603_v44 = vld [vmem:[%s5006_s3 + $0x3cc] ss:$16 sps:$4 sm:$0xff]  }
 0x129   :  { %2135 = vmatprep.mubr.bf16.mxu1 %v4150_v2  ;;  %2004 = vmatprep.subr.bf16.mxu0 %v3522_v45  ;;  %v3529_v2 = vld [vmem:[%s5006_s3 + $0x248] ss:$16 sps:$4 sm:$0xff]   ;;  %v3598_v45 = vld [vmem:[%s5006_s3 + $0x780] ss:$16 sps:$4 sm:$0xff]  }
 0x12a   :  { %2105 = vmatprep.subr.bf16.mxu1 %v3525_v46  ;;  %v3601_v46 = vld [vmem:[%s5006_s3 + $0x3c8] ss:$16 sps:$4 sm:$0xff]  }
 0x12c   :  { %2005 = vmatpush1.bf16.msra.mxu0 %v3520_v47  ;;  %2106 = vmatpush1.bf16.msra.mxu1 %v3523_v48  ;;  %v3606_v47 = vld [vmem:[%s5006_s3 + $0x7a4] ss:$16 sps:$4 sm:$0xff]   ;;  %v3609_v48 = vld [vmem:[%s5006_s3 + $0x3ec] ss:$16 sps:$4 sm:$0xff]  }
 0x12d   :  { %2017 = vmatprep.subr.bf16.mxu0 %v3528_v49  ;;  %2107 = vmatprep.subr.bf16.mxu1 %v3531_v43  ;;  %v3604_v49 = vld [vmem:[%s5006_s3 + $0x7a0] ss:$16 sps:$4 sm:$0xff]   ;;  %v3607_v43 = vld [vmem:[%s5006_s3 + $0x3e8] ss:$16 sps:$4 sm:$0xff]  }
 0x12f   :  { %2007 = vmatmul.mubr.bf16.vlgmr.msra.gmra.mrb[16].mxu0 %v4182_v32 }
 0x130   :  { %2018 = vmatpush1.bf16.msra.mxu0 %v3526_v50  ;;  %2108 = vmatpush1.bf16.msra.mxu1 %v3529_v2  ;;  %v3612_v50 = vld [vmem:[%s5006_s3 + $0x7c4] ss:$16 sps:$4 sm:$0xff]   ;;  %v3615_v2 = vld [vmem:[%s5006_s3 + $0x40c] ss:$16 sps:$4 sm:$0xff]  }
 0x131   :  { %2019 = vmatprep.subr.bf16.mxu0 %v3534_v51  ;;  %2109 = vmatprep.subr.bf16.mxu1 %v3537_v52  ;;  %v3610_v51 = vld [vmem:[%s5006_s3 + $0x7c0] ss:$16 sps:$4 sm:$0xff]   ;;  %v3613_v52 = vld [vmem:[%s5006_s3 + $0x408] ss:$16 sps:$4 sm:$0xff]  }
 0x132   :  { %2049 = vmatprep.mubr.bf16.mxu0 %v4219_v58 }
 0x134   :  { %2020 = vmatpush1.bf16.msra.mxu0 %v3532_v53  ;;  %2110 = vmatpush1.bf16.msra.mxu1 %v3535_v54  ;;  %v3618_v53 = vld [vmem:[%s5006_s3 + $0x7e4] ss:$16 sps:$4 sm:$0xff]   ;;  %v3621_v54 = vld [vmem:[%s5006_s3 + $0x42c] ss:$16 sps:$4 sm:$0xff]  }
 0x135   :  { %2021 = vmatprep.subr.bf16.mxu0 %v3540_v56  ;;  %2111 = vmatprep.subr.bf16.mxu1 %v3543_v57  ;;  %v3616_v56 = vld [vmem:[%s5006_s3 + $0x7e0] ss:$16 sps:$4 sm:$0xff]   ;;  %v3619_v57 = vld [vmem:[%s5006_s3 + $0x428] ss:$16 sps:$4 sm:$0xff]  }
 0x138   :  { %2022 = vmatpush1.bf16.msra.mxu0 %v3538_v59  ;;  %2112 = vmatpush1.bf16.msra.mxu1 %v3541_v60  ;;  %v3624_v59 = vld [vmem:[%s5006_s3 + $0x44c] ss:$16 sps:$4 sm:$0xff]   ;;  %v3622_v60 = vld [vmem:[%s5006_s3 + $0x448] ss:$16 sps:$4 sm:$0xff]  }
 0x139   :  { %2023 = vmatprep.subr.bf16.mxu0 %v3546_v61  ;;  %2113 = vmatprep.subr.bf16.mxu1 %v3549_v62  ;;  %v3627_v61 = vld [vmem:[%s5006_s3 + $0x46c] ss:$16 sps:$4 sm:$0xff]  }
 0x13a   :  { %v3717_v62 = vld [vmem:[%s5008_s5 + $0x14] ss:$8 sps:$4 sm:$0xff]  }
 0x13c   :  { %2024 = vmatpush1.bf16.msra.mxu0 %v3544_v63  ;;  %2114 = vmatpush1.bf16.msra.mxu1 %v3547_v0  ;;  %v3625_v63 = vld [vmem:[%s5006_s3 + $0x468] ss:$16 sps:$4 sm:$0xff]   ;;  %v3630_v0 = vld [vmem:[%s5006_s3 + $0x48c] ss:$16 sps:$4 sm:$0xff]  }
 0x13d   :  { %2025 = vmatprep.subr.bf16.mxu0 %v3552_v3  ;;  %2115 = vmatprep.subr.bf16.mxu1 %v3555_v4  ;;  %v3715_v3 = vld [vmem:[%s5008_s5 + $0x10] ss:$8 sps:$4 sm:$0xff]   ;;  %v3720_v4 = vld [vmem:[%s5008_s5 + $0x24] ss:$8 sps:$4 sm:$0xff]  }
 0x140   :  { %2026 = vmatpush1.bf16.msra.mxu0 %v3550_v5  ;;  %2116 = vmatpush1.bf16.msra.mxu1 %v3553_v6  ;;  %v3628_v5 = vld [vmem:[%s5006_s3 + $0x488] ss:$16 sps:$4 sm:$0xff]   ;;  %v3633_v6 = vld [vmem:[%s5006_s3 + $0x4ac] ss:$16 sps:$4 sm:$0xff]  }
 0x141   :  { %2027 = vmatprep.subr.bf16.mxu0 %v3558_v7  ;;  %2117 = vmatprep.subr.bf16.mxu1 %v3561_v8  ;;  %v3718_v7 = vld [vmem:[%s5008_s5 + $0x20] ss:$8 sps:$4 sm:$0xff]   ;;  %v3723_v8 = vld [vmem:[%s5008_s5 + $0x34] ss:$8 sps:$4 sm:$0xff]  }
 0x144   :  { %2028 = vmatpush1.bf16.msra.mxu0 %v3556_v9  ;;  %2118 = vmatpush1.bf16.msra.mxu1 %v3559_v10  ;;  %v3631_v9 = vld [vmem:[%s5006_s3 + $0x4a8] ss:$16 sps:$4 sm:$0xff]   ;;  %v3636_v10 = vld [vmem:[%s5006_s3 + $0x4cc] ss:$16 sps:$4 sm:$0xff]  }
 0x145   :  { %2029 = vmatprep.subr.bf16.mxu0 %v3564_v11  ;;  %2119 = vmatprep.subr.bf16.mxu1 %v3567_v12  ;;  %v3721_v11 = vld [vmem:[%s5008_s5 + $0x30] ss:$8 sps:$4 sm:$0xff]   ;;  %v3726_v12 = vld [vmem:[%s5008_s5 + $0x44] ss:$8 sps:$4 sm:$0xff]  }
 0x148   :  { %2030 = vmatpush1.bf16.msra.mxu0 %v3562_v13  ;;  %2120 = vmatpush1.bf16.msra.mxu1 %v3565_v14  ;;  %v3634_v13 = vld [vmem:[%s5006_s3 + $0x4c8] ss:$16 sps:$4 sm:$0xff]  }
 0x149   :  { %2031 = vmatprep.subr.bf16.mxu0 %v3570_v15  ;;  %2121 = vmatprep.subr.bf16.mxu1 %v3573_v16  ;;  %v3724_v14 = vld [vmem:[%s5008_s5 + $0x40] ss:$8 sps:$4 sm:$0xff]   ;;  %v3639_v15 = vld [vmem:[%s5006_s3 + $0x4ec] ss:$16 sps:$4 sm:$0xff]  }
 0x14a   :  { %v3729_v16 = vld [vmem:[%s5008_s5 + $0x54] ss:$8 sps:$4 sm:$0xff]  }
 0x14c   :  { %2032 = vmatpush1.bf16.msra.mxu0 %v3568_v17  ;;  %2122 = vmatpush1.bf16.msra.mxu1 %v3571_v18  ;;  %v3637_v17 = vld [vmem:[%s5006_s3 + $0x4e8] ss:$16 sps:$4 sm:$0xff]  }
 0x14d   :  { %2033 = vmatprep.subr.bf16.mxu0 %v3576_v19  ;;  %2123 = vmatprep.subr.bf16.mxu1 %v3579_v20  ;;  %v3727_v18 = vld [vmem:[%s5008_s5 + $0x50] ss:$8 sps:$4 sm:$0xff]   ;;  %v3642_v19 = vld [vmem:[%s5006_s3 + $0x50c] ss:$16 sps:$4 sm:$0xff]  }
 0x14e   :  { %v3732_v20 = vld [vmem:[%s5008_s5 + $0x64] ss:$8 sps:$4 sm:$0xff]  }
 0x150   :  { %2034 = vmatpush1.bf16.msra.mxu0 %v3574_v25  ;;  %2124 = vmatpush1.bf16.msra.mxu1 %v3577_v26  ;;  %v3640_v25 = vld [vmem:[%s5006_s3 + $0x508] ss:$16 sps:$4 sm:$0xff]  }
 0x151   :  { %2035 = vmatprep.subr.bf16.mxu0 %v3582_v27  ;;  %2125 = vmatprep.subr.bf16.mxu1 %v3585_v28  ;;  %v3730_v26 = vld [vmem:[%s5008_s5 + $0x60] ss:$8 sps:$4 sm:$0xff]   ;;  %v3645_v27 = vld [vmem:[%s5006_s3 + $0x52c] ss:$16 sps:$4 sm:$0xff]  }
 0x152   :  { %v3735_v28 = vld [vmem:[%s5008_s5 + $0x74] ss:$8 sps:$4 sm:$0xff]  }
 0x154   :  { %2036 = vmatpush1.bf16.msra.mxu0 %v3580_v29  ;;  %2126 = vmatpush1.bf16.msra.mxu1 %v3583_v31  ;;  %v3643_v29 = vld [vmem:[%s5006_s3 + $0x528] ss:$16 sps:$4 sm:$0xff]  }
 0x155   :  { %2037 = vmatprep.subr.bf16.mxu0 %v3588_v34  ;;  %2127 = vmatprep.subr.bf16.mxu1 %v3591_v35  ;;  %v3733_v31 = vld [vmem:[%s5008_s5 + $0x70] ss:$8 sps:$4 sm:$0xff]   ;;  %v3648_v34 = vld [vmem:[%s5006_s3 + $0x54c] ss:$16 sps:$4 sm:$0xff]  }
 0x156   :  { %v3738_v35 = vld [vmem:[%s5008_s5 + $0x84] ss:$8 sps:$4 sm:$0xff]  }
 0x158   :  { %2038 = vmatpush1.bf16.msra.mxu0 %v3586_v37  ;;  %2128 = vmatpush1.bf16.msra.mxu1 %v3589_v23  ;;  %v3646_v37 = vld [vmem:[%s5006_s3 + $0x548] ss:$16 sps:$4 sm:$0xff]  }
 0x159   :  { %2039 = vmatprep.subr.bf16.mxu0 %v3594_v38  ;;  %2129 = vmatprep.subr.bf16.mxu1 %v3597_v39  ;;  %v3736_v23 = vld [vmem:[%s5008_s5 + $0x80] ss:$8 sps:$4 sm:$0xff]   ;;  %v3651_v38 = vld [vmem:[%s5006_s3 + $0x56c] ss:$16 sps:$4 sm:$0xff]  }
 0x15a   :  { %v3741_v39 = vld [vmem:[%s5008_s5 + $0x94] ss:$8 sps:$4 sm:$0xff]  }
 0x15c   :  { %2040 = vmatpush1.bf16.msra.mxu0 %v3592_v40  ;;  %2130 = vmatpush1.bf16.msra.mxu1 %v3595_v41  ;;  %v3649_v40 = vld [vmem:[%s5006_s3 + $0x568] ss:$16 sps:$4 sm:$0xff]  }
 0x15d   :  { %2041 = vmatprep.subr.bf16.mxu0 %v3600_v42  ;;  %2131 = vmatprep.subr.bf16.mxu1 %v3603_v44  ;;  %v3739_v41 = vld [vmem:[%s5008_s5 + $0x90] ss:$8 sps:$4 sm:$0xff]   ;;  %v3654_v42 = vld [vmem:[%s5006_s3 + $0x58c] ss:$16 sps:$4 sm:$0xff]  }
 0x15e   :  { %v3744_v44 = vld [vmem:[%s5008_s5 + $0xa4] ss:$8 sps:$4 sm:$0xff]  }
 0x160   :  { %2042 = vmatpush1.bf16.msra.mxu0 %v3598_v45  ;;  %2132 = vmatpush1.bf16.msra.mxu1 %v3601_v46  ;;  %v3652_v45 = vld [vmem:[%s5006_s3 + $0x588] ss:$16 sps:$4 sm:$0xff]  }
 0x161   :  { %2043 = vmatprep.subr.bf16.mxu0 %v3606_v47  ;;  %2133 = vmatprep.subr.bf16.mxu1 %v3609_v48  ;;  %v3742_v46 = vld [vmem:[%s5008_s5 + $0xa0] ss:$8 sps:$4 sm:$0xff]   ;;  %v3657_v47 = vld [vmem:[%s5006_s3 + $0x5ac] ss:$16 sps:$4 sm:$0xff]  }
 0x162   :  { %v3747_v48 = vld [vmem:[%s5008_s5 + $0xb4] ss:$8 sps:$4 sm:$0xff]  }
 0x164   :  { %2044 = vmatpush1.bf16.msra.mxu0 %v3604_v49  ;;  %2134 = vmatpush1.bf16.msra.mxu1 %v3607_v43  ;;  %v3655_v49 = vld [vmem:[%s5006_s3 + $0x5a8] ss:$16 sps:$4 sm:$0xff]  }
 0x165   :  { %2045 = vmatprep.subr.bf16.mxu0 %v3612_v50  ;;  %2146 = vmatprep.subr.bf16.mxu1 %v3615_v2  ;;  %v3745_v43 = vld [vmem:[%s5008_s5 + $0xb0] ss:$8 sps:$4 sm:$0xff]   ;;  %v3660_v50 = vld [vmem:[%s5006_s3 + $0x5cc] ss:$16 sps:$4 sm:$0xff]  }
 0x166   :  { %v3750_v2 = vld [vmem:[%s5008_s5 + $0xc4] ss:$8 sps:$4 sm:$0xff]  }
 0x167   :  { %2136 = vmatmul.mubr.bf16.vlgmr.msra.gmra.mrb[4].mxu1 %v4148_v1  ;;  %v3714_v1 = vld [vmem:[%s5008_s5 + $0x4] ss:$8 sps:$4 sm:$0xff]  }
 0x168   :  { %2046 = vmatpush1.bf16.msra.mxu0 %v3610_v51  ;;  %2147 = vmatpush1.bf16.msra.mxu1 %v3613_v52  ;;  %v3658_v51 = vld [vmem:[%s5006_s3 + $0x5c8] ss:$16 sps:$4 sm:$0xff]  }
 0x169   :  { %2178 = vmatprep.mubr.bf16.mxu1 %v4190_v36  ;;  %2047 = vmatprep.subr.bf16.mxu0 %v3618_v53  ;;  %v3712_v36 = vld [vmem:[%s5008_s5] ss:$8 sps:$4 sm:$0xff]   ;;  %v3663_v53 = vld [vmem:[%s5006_s3 + $0x5ec] ss:$16 sps:$4 sm:$0xff]  }
 0x16a   :  { %2148 = vmatprep.subr.bf16.mxu1 %v3621_v54  ;;  %v3748_v52 = vld [vmem:[%s5008_s5 + $0xc0] ss:$8 sps:$4 sm:$0xff]   ;;  %v3753_v54 = vld [vmem:[%s5008_s5 + $0xd4] ss:$8 sps:$4 sm:$0xff]  }
 0x16c   :  { %2048 = vmatpush1.bf16.msra.mxu0 %v3616_v56  ;;  %2149 = vmatpush1.bf16.msra.mxu1 %v3619_v57  ;;  %v3661_v56 = vld [vmem:[%s5006_s3 + $0x5e8] ss:$16 sps:$4 sm:$0xff]  }
 0x16d   :  { %2150 = vmatprep.subr.bf16.mxu1 %v3624_v59  ;;  %2640 = vmatprep.subr.bf16.mxu0 %v3714_v1  ;;  %v3751_v57 = vld [vmem:[%s5008_s5 + $0xd0] ss:$8 sps:$4 sm:$0xff]   ;;  %v3666_v59 = vld [vmem:[%s5006_s3 + $0x60c] ss:$16 sps:$4 sm:$0xff]  }
 0x16e   :  { %v3664_v1 = vld [vmem:[%s5006_s3 + $0x608] ss:$16 sps:$4 sm:$0xff]  }
 0x16f   :  { %2050 = vmatmul.mubr.bf16.vlgmr.msra.gmra.mrb[16].mxu0 %v4211_v55 }
 0x170   :  { %2151 = vmatpush1.bf16.msra.mxu1 %v3622_v60  ;;  %2641 = vmatpush1.bf16.msra.mxu0 %v3712_v36  ;;  %v3669_v60 = vld [vmem:[%s5006_s3 + $0x62c] ss:$16 sps:$4 sm:$0xff]  }
 0x171   :  { %2152 = vmatprep.subr.bf16.mxu1 %v3627_v61  ;;  %2642 = vmatprep.subr.bf16.mxu0 %v3717_v62  ;;  %v3667_v61 = vld [vmem:[%s5006_s3 + $0x628] ss:$16 sps:$4 sm:$0xff]   ;;  %v3672_v36 = vld [vmem:[%s5006_s3 + $0x64c] ss:$16 sps:$4 sm:$0xff]  }
 0x172   :  { %v3670_v62 = vld [vmem:[%s5006_s3 + $0x648] ss:$16 sps:$4 sm:$0xff]  }
 0x174   :  { %2153 = vmatpush1.bf16.msra.mxu1 %v3625_v63  ;;  %2643 = vmatpush1.bf16.msra.mxu0 %v3715_v3  ;;  %v3678_v63 = vld [vmem:[%s5006_s3 + $0x68c] ss:$16 sps:$4 sm:$0xff]  }
 0x175   :  { %2154 = vmatprep.subr.bf16.mxu1 %v3630_v0  ;;  %2644 = vmatprep.subr.bf16.mxu0 %v3720_v4  ;;  %v3676_v0 = vld [vmem:[%s5006_s3 + $0x688] ss:$16 sps:$4 sm:$0xff]   ;;  %v3681_v3 = vld [vmem:[%s5006_s3 + $0x6ac] ss:$16 sps:$4 sm:$0xff]  }
 0x176   :  { %v3679_v4 = vld [vmem:[%s5006_s3 + $0x6a8] ss:$16 sps:$4 sm:$0xff]  }
 0x178   :  { %2155 = vmatpush1.bf16.msra.mxu1 %v3628_v5  ;;  %2645 = vmatpush1.bf16.msra.mxu0 %v3718_v7  ;;  %v3684_v5 = vld [vmem:[%s5006_s3 + $0x6cc] ss:$16 sps:$4 sm:$0xff]  }
 0x179   :  { %2156 = vmatprep.subr.bf16.mxu1 %v3633_v6  ;;  %2646 = vmatprep.subr.bf16.mxu0 %v3723_v8 }
 0x17c   :  { %2157 = vmatpush1.bf16.msra.mxu1 %v3631_v9  ;;  %2647 = vmatpush1.bf16.msra.mxu0 %v3721_v11  ;;  %v3682_v9 = vld [vmem:[%s5006_s3 + $0x6c8] ss:$16 sps:$4 sm:$0xff]   ;;  %v3687_v11 = vld [vmem:[%s5006_s3 + $0x6ec] ss:$16 sps:$4 sm:$0xff]  }
 0x17d   :  { %2158 = vmatprep.subr.bf16.mxu1 %v3636_v10  ;;  %2648 = vmatprep.subr.bf16.mxu0 %v3726_v12  ;;  %v3685_v12 = vld [vmem:[%s5006_s3 + $0x6e8] ss:$16 sps:$4 sm:$0xff]  }
 0x180   :  { %2159 = vmatpush1.bf16.msra.mxu1 %v3634_v13  ;;  %2649 = vmatpush1.bf16.msra.mxu0 %v3724_v14  ;;  %v3690_v13 = vld [vmem:[%s5006_s3 + $0x70c] ss:$16 sps:$4 sm:$0xff]   ;;  %v3688_v14 = vld [vmem:[%s5006_s3 + $0x708] ss:$16 sps:$4 sm:$0xff]  }
 0x181   :  { %2160 = vmatprep.subr.bf16.mxu1 %v3639_v15  ;;  %2650 = vmatprep.subr.bf16.mxu0 %v3729_v16  ;;  %v3756_v15 = vld [vmem:[%s5008_s5 + $0xe4] ss:$8 sps:$4 sm:$0xff]  }
 0x182   :  { %v3693_v16 = vld [vmem:[%s5006_s3 + $0x72c] ss:$16 sps:$4 sm:$0xff]  }
 0x184   :  { %2161 = vmatpush1.bf16.msra.mxu1 %v3637_v17  ;;  %2651 = vmatpush1.bf16.msra.mxu0 %v3727_v18  ;;  %v3754_v17 = vld [vmem:[%s5008_s5 + $0xe0] ss:$8 sps:$4 sm:$0xff]  }
 0x185   :  { %2162 = vmatprep.subr.bf16.mxu1 %v3642_v19  ;;  %2652 = vmatprep.subr.bf16.mxu0 %v3732_v20  ;;  %v3691_v18 = vld [vmem:[%s5006_s3 + $0x728] ss:$16 sps:$4 sm:$0xff]   ;;  %v3759_v19 = vld [vmem:[%s5008_s5 + $0xf4] ss:$8 sps:$4 sm:$0xff]  }
 0x186   :  { %v3696_v20 = vld [vmem:[%s5006_s3 + $0x74c] ss:$16 sps:$4 sm:$0xff]  }
 0x188   :  { %2163 = vmatpush1.bf16.msra.mxu1 %v3640_v25  ;;  %2653 = vmatpush1.bf16.msra.mxu0 %v3730_v26  ;;  %v3757_v25 = vld [vmem:[%s5008_s5 + $0xf0] ss:$8 sps:$4 sm:$0xff]  }
 0x189   :  { %2164 = vmatprep.subr.bf16.mxu1 %v3645_v27  ;;  %2654 = vmatprep.subr.bf16.mxu0 %v3735_v28  ;;  %v3694_v26 = vld [vmem:[%s5006_s3 + $0x748] ss:$16 sps:$4 sm:$0xff]   ;;  %v3699_v27 = vld [vmem:[%s5006_s3 + $0x76c] ss:$16 sps:$4 sm:$0xff]  }
 0x18a   :  { %v3762_v28 = vld [vmem:[%s5008_s5 + $0x104] ss:$8 sps:$4 sm:$0xff]  }
 0x18c   :  { %2165 = vmatpush1.bf16.msra.mxu1 %v3643_v29  ;;  %2655 = vmatpush1.bf16.msra.mxu0 %v3733_v31  ;;  %v3697_v29 = vld [vmem:[%s5006_s3 + $0x768] ss:$16 sps:$4 sm:$0xff]   ;;  %v3702_v31 = vld [vmem:[%s5006_s3 + $0x78c] ss:$16 sps:$4 sm:$0xff]  }
 0x18d   :  { %2166 = vmatprep.subr.bf16.mxu1 %v3648_v34  ;;  %2656 = vmatprep.subr.bf16.mxu0 %v3738_v35  ;;  %v3700_v34 = vld [vmem:[%s5006_s3 + $0x788] ss:$16 sps:$4 sm:$0xff]   ;;  %v3705_v35 = vld [vmem:[%s5006_s3 + $0x7ac] ss:$16 sps:$4 sm:$0xff]  }
 0x190   :  { %2167 = vmatpush1.bf16.msra.mxu1 %v3646_v37  ;;  %2657 = vmatpush1.bf16.msra.mxu0 %v3736_v23  ;;  %v3703_v37 = vld [vmem:[%s5006_s3 + $0x7a8] ss:$16 sps:$4 sm:$0xff]   ;;  %v3708_v23 = vld [vmem:[%s5006_s3 + $0x7cc] ss:$16 sps:$4 sm:$0xff]  }
 0x191   :  { %2168 = vmatprep.subr.bf16.mxu1 %v3651_v38  ;;  %2658 = vmatprep.subr.bf16.mxu0 %v3741_v39  ;;  %v3706_v38 = vld [vmem:[%s5006_s3 + $0x7c8] ss:$16 sps:$4 sm:$0xff]   ;;  %v3711_v39 = vld [vmem:[%s5006_s3 + $0x7ec] ss:$16 sps:$4 sm:$0xff]  }
 0x194   :  { %2169 = vmatpush1.bf16.msra.mxu1 %v3649_v40  ;;  %2659 = vmatpush1.bf16.msra.mxu0 %v3739_v41  ;;  %v3709_v40 = vld [vmem:[%s5006_s3 + $0x7e8] ss:$16 sps:$4 sm:$0xff]   ;;  %v4837_v41 = vld [vmem:[%s5009_s4] sm:$0xf] }
 0x195   :  { %2170 = vmatprep.subr.bf16.mxu1 %v3654_v42  ;;  %2660 = vmatprep.subr.bf16.mxu0 %v3744_v44  ;;  %v591_v42 = vrot.slane %v4837_v41, %v4107_v22  ;;  %v595_v44 = vrot.slane %v4837_v41, %v4115_v24 }
 0x198   :  { %2171 = vmatpush1.bf16.msra.mxu1 %v3652_v45  ;;  %2661 = vmatpush1.bf16.msra.mxu0 %v3742_v46 }
 0x199   :  { %2172 = vmatprep.subr.bf16.mxu1 %v3657_v47  ;;  %2662 = vmatprep.subr.bf16.mxu0 %v3747_v48 }
 0x19c   :  { %2173 = vmatpush1.bf16.msra.mxu1 %v3655_v49  ;;  %2663 = vmatpush1.bf16.msra.mxu0 %v3745_v43 }
 0x19d   :  { %2174 = vmatprep.subr.bf16.mxu1 %v3660_v50  ;;  %2664 = vmatprep.subr.bf16.mxu0 %v3750_v2 }
 0x1a0   :  { %2175 = vmatpush1.bf16.msra.mxu1 %v3658_v51  ;;  %2665 = vmatpush1.bf16.msra.mxu0 %v3748_v52 }
 0x1a1   :  { %2176 = vmatprep.subr.bf16.mxu1 %v3663_v53  ;;  %2666 = vmatprep.subr.bf16.mxu0 %v3753_v54 }
 0x1a4   :  { %2177 = vmatpush1.bf16.msra.mxu1 %v3661_v56  ;;  %2667 = vmatpush1.bf16.msra.mxu0 %v3751_v57  ;;  %v3808_v57 = vld [vmem:[%s5010_s7 + $0x40] sm:$0xff]  }
 0x1a5   :  { %2189 = vmatprep.subr.bf16.mxu1 %v3666_v59  ;;  %2668 = vmatprep.subr.bf16.mxu0 %v3756_v15  ;;  %v3772_v15 = vld [vmem:[%s5008_s5 + $0x140] ss:$8 sps:$4 sm:$0xff]  }
 0x1a7   :  { %2179 = vmatmul.mubr.bf16.vlgmr.msra.gmra.mrb[4].mxu1 %v4182_v32  ;;  %v3675_v32 = vld [vmem:[%s5006_s3 + $0x66c] ss:$16 sps:$4 sm:$0xff]  }
 0x1a8   :  { %2190 = vmatpush1.bf16.msra.mxu1 %v3664_v1  ;;  %2221 = vmatprep.mubr.bf16.mxu1 %v4219_v58  ;;  %v3673_v58 = vld [vmem:[%s5006_s3 + $0x668] ss:$16 sps:$4 sm:$0xff]   ;;  %v3809_v1 = vld [vmem:[%s5010_s7] sm:$0xff]  }
 0x1a9   :  { %2191 = vmatprep.subr.bf16.mxu1 %v3669_v60  ;;  %2669 = vmatpush1.bf16.msra.mxu0 %v3754_v17  ;;  %v3775_v17 = vld [vmem:[%s5008_s5 + $0x150] ss:$8 sps:$4 sm:$0xff]  }
 0x1aa   :  { %2670 = vmatprep.subr.bf16.mxu0 %v3759_v19  ;;  %v3778_v19 = vld [vmem:[%s5008_s5 + $0x160] ss:$8 sps:$4 sm:$0xff]  }
 0x1ac   :  { %2192 = vmatpush1.bf16.msra.mxu1 %v3667_v61  ;;  %v3760_v61 = vld [vmem:[%s5008_s5 + $0x100] ss:$8 sps:$4 sm:$0xff]  }
 0x1ad   :  { %2193 = vmatprep.subr.bf16.mxu1 %v3672_v36  ;;  %2671 = vmatpush1.bf16.msra.mxu0 %v3757_v25  ;;  %v3810_v36 = vld [vmem:[%s5010_s7 + $0x48] sm:$0xff]   ;;  %v3781_v25 = vld [vmem:[%s5008_s5 + $0x170] ss:$8 sps:$4 sm:$0xff]  }
 0x1ae   :  { %2683 = vmatprep.subr.bf16.mxu0 %v3762_v28  ;;  %v3789_v28 = vld [vmem:[%s5008_s5 + $0x194] ss:$8 sps:$4 sm:$0xff]  }
 0x1b0   :  { %2194 = vmatpush1.bf16.msra.mxu1 %v3670_v62 }
 0x1b1   :  { %2195 = vmatprep.subr.bf16.mxu1 %v3675_v32  ;;  %v3811_v32 = vld [vmem:[%s5010_s7 + $0x8] sm:$0xff]  }
 0x1b4   :  { %2196 = vmatpush1.bf16.msra.mxu1 %v3673_v58 }
 0x1b5   :  { %2197 = vmatprep.subr.bf16.mxu1 %v3678_v63  ;;  %v3812_v63 = vld [vmem:[%s5010_s7 + $0x50] sm:$0xff]  }
 0x1b8   :  { %2198 = vmatpush1.bf16.msra.mxu1 %v3676_v0  ;;  %v3765_v0 = vld [vmem:[%s5008_s5 + $0x114] ss:$8 sps:$4 sm:$0xff]  }
 0x1b9   :  { %2199 = vmatprep.subr.bf16.mxu1 %v3681_v3  ;;  %v3763_v3 = vld [vmem:[%s5008_s5 + $0x110] ss:$8 sps:$4 sm:$0xff]  }
 0x1ba   :  { %v1922_v6 = vpop.f32.mrb[0].mxu1 }
 0x1bb   :  { %v1924_v7 = vpop.f32.mrb[1].mxu1  ;;  %v1923_v45 = vadd.f32 %v1922_v6, %v591_v42  ;;  %v3768_v6 = vld [vmem:[%s5008_s5 + $0x124] ss:$8 sps:$4 sm:$0xff]  }
 0x1bc   :  { %2200 = vmatpush1.bf16.msra.mxu1 %v3679_v4  ;;  %v1926_v8 = vpop.f32.mrb[2].mxu1  ;;  %v1925_v46 = vadd.f32 %v1924_v7, %v595_v44  ;;  %v3813_v4 = vld [vmem:[%s5010_s7 + $0x10] sm:$0xff]   ;;  %v3766_v7 = vld [vmem:[%s5008_s5 + $0x120] ss:$8 sps:$4 sm:$0xff]  }
 0x1bd   :  { %v1928_v10 = vpop.f32.mrb[3].mxu1  ;;  %2201 = vmatprep.subr.bf16.mxu1 %v3684_v5  ;;  %v1927_v48 = vadd.f32 %v1926_v8, %v591_v42  ;;  %v3814_v5 = vld [vmem:[%s5010_s7 + $0x58] sm:$0xff]   ;;  %v3804_v42 = vld [vmem:[%s5008_s5 + $0x1e4] ss:$8 sps:$4 sm:$0xff]  }
 0x1be   :  { %v1929_v50 = vadd.f32 %v1928_v10, %v595_v44  ;;  %v3815_v8 = vld [vmem:[%s5010_s7 + $0x18] sm:$0xff]   ;;  %v3816_v10 = vld [vmem:[%s5010_s7 + $0x60] sm:$0xff]  }
 0x1bf   :  { %v3802_v44 = vld [vmem:[%s5008_s5 + $0x1e0] ss:$8 sps:$4 sm:$0xff]  }
 0x1c0   :  { %2202 = vmatpush1.bf16.msra.mxu1 %v3682_v9  ;;  %v3771_v9 = vld [vmem:[%s5008_s5 + $0x134] ss:$8 sps:$4 sm:$0xff]  }
 0x1c1   :  { %2203 = vmatprep.subr.bf16.mxu1 %v3687_v11  ;;  %v3817_v11 = vld [vmem:[%s5010_s7 + $0x20] sm:$0xff]  }
 0x1c4   :  { %2204 = vmatpush1.bf16.msra.mxu1 %v3685_v12  ;;  %v3769_v12 = vld [vmem:[%s5008_s5 + $0x130] ss:$8 sps:$4 sm:$0xff]  }
 0x1c5   :  { %2205 = vmatprep.subr.bf16.mxu1 %v3690_v13  ;;  %v3818_v13 = vld [vmem:[%s5010_s7 + $0x68] sm:$0xff]  }
 0x1c8   :  { %2206 = vmatpush1.bf16.msra.mxu1 %v3688_v14  ;;  %v3774_v14 = vld [vmem:[%s5008_s5 + $0x144] ss:$8 sps:$4 sm:$0xff]  }
 0x1c9   :  { %2207 = vmatprep.subr.bf16.mxu1 %v3693_v16  ;;  %v3777_v16 = vld [vmem:[%s5008_s5 + $0x154] ss:$8 sps:$4 sm:$0xff]  }
 0x1cc   :  { %2208 = vmatpush1.bf16.msra.mxu1 %v3691_v18  ;;  %v3780_v18 = vld [vmem:[%s5008_s5 + $0x164] ss:$8 sps:$4 sm:$0xff]  }
 0x1cd   :  { %2209 = vmatprep.subr.bf16.mxu1 %v3696_v20  ;;  %v3783_v20 = vld [vmem:[%s5008_s5 + $0x174] ss:$8 sps:$4 sm:$0xff]  }
 0x1d0   :  { %2210 = vmatpush1.bf16.msra.mxu1 %v3694_v26  ;;  %v3786_v26 = vld [vmem:[%s5008_s5 + $0x184] ss:$8 sps:$4 sm:$0xff]  }
 0x1d1   :  { %2211 = vmatprep.subr.bf16.mxu1 %v3699_v27  ;;  %v3784_v27 = vld [vmem:[%s5008_s5 + $0x180] ss:$8 sps:$4 sm:$0xff]  }
 0x1d4   :  { %2212 = vmatpush1.bf16.msra.mxu1 %v3697_v29  ;;  %v3787_v29 = vld [vmem:[%s5008_s5 + $0x190] ss:$8 sps:$4 sm:$0xff]  }
 0x1d5   :  { %2213 = vmatprep.subr.bf16.mxu1 %v3702_v31  ;;  %v3792_v31 = vld [vmem:[%s5008_s5 + $0x1a4] ss:$8 sps:$4 sm:$0xff]  }
 0x1d8   :  { %2214 = vmatpush1.bf16.msra.mxu1 %v3700_v34  ;;  %v3790_v34 = vld [vmem:[%s5008_s5 + $0x1a0] ss:$8 sps:$4 sm:$0xff]  }
 0x1d9   :  { %2215 = vmatprep.subr.bf16.mxu1 %v3705_v35  ;;  %v3795_v35 = vld [vmem:[%s5008_s5 + $0x1b4] ss:$8 sps:$4 sm:$0xff]  }
 0x1dc   :  { %2216 = vmatpush1.bf16.msra.mxu1 %v3703_v37  ;;  %v3793_v37 = vld [vmem:[%s5008_s5 + $0x1b0] ss:$8 sps:$4 sm:$0xff]  }
 0x1dd   :  { %2217 = vmatprep.subr.bf16.mxu1 %v3708_v23  ;;  %v3798_v23 = vld [vmem:[%s5008_s5 + $0x1c4] ss:$8 sps:$4 sm:$0xff]  }
 0x1e0   :  { %2218 = vmatpush1.bf16.msra.mxu1 %v3706_v38  ;;  %v3796_v38 = vld [vmem:[%s5008_s5 + $0x1c0] ss:$8 sps:$4 sm:$0xff]  }
 0x1e1   :  { %2219 = vmatprep.subr.bf16.mxu1 %v3711_v39  ;;  %v3801_v39 = vld [vmem:[%s5008_s5 + $0x1d4] ss:$8 sps:$4 sm:$0xff]  }
 0x1e4   :  { %2220 = vmatpush1.bf16.msra.mxu1 %v3709_v40  ;;  %v3799_v40 = vld [vmem:[%s5008_s5 + $0x1d0] ss:$8 sps:$4 sm:$0xff]  }
 0x1e5   :  { %3264 = vmatprep.subr.bf16.mxu1 %v3808_v57 }
 0x1e7   :  { %2222 = vmatmul.mubr.bf16.vlgmr.msra.gmra.mrb[4].mxu1 %v4211_v55 }
 0x1e8   :  { %3265 = vmatpush3.bf16.msra.mxu1 %v3809_v1 }
 0x1e9   :  { %3266 = vmatprep.subr.bf16.mxu1 %v3810_v36  ;;  %v2308_v36 = vld [vmem:[%s5011_s6] sm:$0x3] }
 0x1ec   :  { %3267 = vmatpush3.bf16.msra.mxu1 %v3811_v32  ;;  %v2317_v32 = vrot.slane %v2308_v36, %v4115_v24 }
 0x1ed   :  { %3268 = vmatprep.subr.bf16.mxu1 %v3812_v63 }
 0x1f0   :  { %3269 = vmatpush3.bf16.msra.mxu1 %v3813_v4 }
 0x1f1   :  { %3270 = vmatprep.subr.bf16.mxu1 %v3814_v5 }
 0x1f4   :  { %3271 = vmatpush3.bf16.msra.mxu1 %v3815_v8 }
 0x1f5   :  { %3272 = vmatprep.subr.bf16.mxu1 %v3816_v10 }
 0x1f8   :  { %3273 = vmatpush3.bf16.msra.mxu1 %v3817_v11 }
 0x1f9   :  { %3274 = vmatprep.subr.bf16.mxu1 %v3818_v13 }
 0x1fc   :  { %3275 = vmatpush3.bf16.msra.mxu1 %v3819_v21 }
 0x242   :  { %v2051_v47 = vpop.f32.mrb[16].mxu0 }
 0x243   :  { %v3287_v49 = vadd.f32 %v2051_v47, %v1923_v45  ;;  %v2053_v43 = vpop.f32.mrb[17].mxu0  ;;  %v3807_v45 = vld [vmem:[%s5008_s5 + $0x1f4] ss:$8 sps:$4 sm:$0xff]   ;;  %v599_v47 = vrot.slane %v4837_v41, %v55_v30 }
 0x244   :  { %v3289_v2 = vadd.f32 %v2053_v43, %v1925_v46  ;;  %v2055_v55 = vpop.f32.mrb[18].mxu0  ;;  %v3805_v46 = vld [vmem:[%s5008_s5 + $0x1f0] ss:$8 sps:$4 sm:$0xff]  }
 0x245   :  { %v2232_v51 = vmax.f32 %v3287_v49, 0.0  ;;  %v3291_v52 = vadd.f32 %v2055_v55, %v1927_v48  ;;  %v2057_v53 = vpop.f32.mrb[19].mxu0  ;;  %v603_v48 = vrot.slane %v4837_v41, %v59_v33  ;;  %v3820_v30 = vld [vmem:[%s5010_s7 + $0x70] sm:$0xff]   ;;  %v3822_v41 = vld [vmem:[%s5010_s7 + $0x78] sm:$0xff]  }
 0x246   :  { %v2233_v54 = vmax.f32 %v3289_v2, 0.0  ;;  %v3293_v56 = vadd.f32 %v2057_v53, %v1929_v50  ;;  %v3821_v33 = vld [vmem:[%s5010_s7 + $0x30] sm:$0xff]   ;;  %3276 = vmatprep.subr.bf16.mxu1 %v3820_v30 }
 0x247   :  { %v2236_v59 = vmax.f32 %v3291_v52, 0.0  ;;  %3277 = vmatpush3.bf16.msra.mxu1 %v3821_v33 }
 0x248   :  { %v2237_v60 = vmax.f32 %v3293_v56, 0.0  ;;  %3278 = vmatprep.subr.bf16.mxu1 %v3822_v41 }
 0x249   :  { %v2240_v62 = vpack.c.bf16 %v2236_v59, %v2232_v51 }
 0x24a   :  { %v2241_v58 = vpack.c.bf16 %v2237_v60, %v2233_v54 }
 0x24c   :  { %2672 = vmatprep.mubr.bf16.mxu0 %v2241_v58 }
 0x24d   :  { %2673 = vmatmul.mubr.bf16.vlgmr.msra.gmra.mrb[20].mxu0 %v2240_v62  ;;  %v2313_v62 = vrot.slane %v2308_v36, %v4107_v22  ;;  %v3247_v22 = vld [vmem:[%s5012_s8] ss:$0 sm:$0xff] }
 0x24e   :  { %2684 = vmatpush1.bf16.msra.mxu0 %v3760_v61  ;;  %v3823_v61 = vld [vmem:[%s5010_s7 + $0x38] sm:$0xff]  }
 0x24f   :  { %2685 = vmatprep.subr.bf16.mxu0 %v3765_v0  ;;  %3279 = vmatpush3.bf16.msra.mxu1 %v3823_v61 }
 0x252   :  { %2686 = vmatpush1.bf16.msra.mxu0 %v3763_v3 }
 0x253   :  { %2687 = vmatprep.subr.bf16.mxu0 %v3768_v6 }
 0x256   :  { %2688 = vmatpush1.bf16.msra.mxu0 %v3766_v7 }
 0x257   :  { %2689 = vmatprep.subr.bf16.mxu0 %v3771_v9 }
 0x25a   :  { %2690 = vmatpush1.bf16.msra.mxu0 %v3769_v12 }
 0x25b   :  { %2691 = vmatprep.subr.bf16.mxu0 %v3774_v14 }
 0x25e   :  { %2692 = vmatpush1.bf16.msra.mxu0 %v3772_v15 }
 0x25f   :  { %2693 = vmatprep.subr.bf16.mxu0 %v3777_v16 }
 0x262   :  { %2694 = vmatpush1.bf16.msra.mxu0 %v3775_v17 }
 0x263   :  { %2695 = vmatprep.subr.bf16.mxu0 %v3780_v18 }
 0x266   :  { %2696 = vmatpush1.bf16.msra.mxu0 %v3778_v19 }
 0x267   :  { %2697 = vmatprep.subr.bf16.mxu0 %v3783_v20 }
 0x26a   :  { %2698 = vmatpush1.bf16.msra.mxu0 %v3781_v25 }
 0x26b   :  { %2699 = vmatprep.subr.bf16.mxu0 %v3786_v26 }
 0x26e   :  { %2700 = vmatpush1.bf16.msra.mxu0 %v3784_v27 }
 0x26f   :  { %2701 = vmatprep.subr.bf16.mxu0 %v3789_v28 }
 0x272   :  { %2702 = vmatpush1.bf16.msra.mxu0 %v3787_v29 }
 0x273   :  { %2703 = vmatprep.subr.bf16.mxu0 %v3792_v31 }
 0x276   :  { %2704 = vmatpush1.bf16.msra.mxu0 %v3790_v34 }
 0x277   :  { %2705 = vmatprep.subr.bf16.mxu0 %v3795_v35 }
 0x27a   :  { %2706 = vmatpush1.bf16.msra.mxu0 %v3793_v37 }
 0x27b   :  { %2707 = vmatprep.subr.bf16.mxu0 %v3798_v23 }
 0x27e   :  { %2708 = vmatpush1.bf16.msra.mxu0 %v3796_v38 }
 0x27f   :  { %2709 = vmatprep.subr.bf16.mxu0 %v3801_v39 }
 0x282   :  { %2710 = vmatpush1.bf16.msra.mxu0 %v3799_v40 }
 0x283   :  { %2711 = vmatprep.subr.bf16.mxu0 %v3804_v42 }
 0x286   :  { %2712 = vmatpush1.bf16.msra.mxu0 %v3802_v44 }
 0x287   :  { %2713 = vmatprep.subr.bf16.mxu0 %v3807_v45 }
 0x28a   :  { %2714 = vmatpush1.bf16.msra.mxu0 %v3805_v46 }
 0x2ba   :  { %v2223_v49 = vpop.f32.mrb[4].mxu1 }
 0x2bb   :  { %v3294_v43 = vadd.f32 %v2223_v49, %v599_v47  ;;  %v2225_v50 = vpop.f32.mrb[5].mxu1 }
 0x2bc   :  { %v3295_v2 = vadd.f32 %v2225_v50, %v603_v48  ;;  %v2227_v55 = vpop.f32.mrb[6].mxu1 }
 0x2bd   :  { %v3296_v51 = vadd.f32 %v2227_v55, %v599_v47  ;;  %v2229_v52 = vpop.f32.mrb[7].mxu1  ;;  %v2234_v54 = vmax.f32 %v3294_v43, 0.0 }
 0x2be   :  { %v3297_v53 = vadd.f32 %v2229_v52, %v603_v48  ;;  %v2235_v57 = vmax.f32 %v3295_v2, 0.0 }
 0x2bf   :  { %v2238_v56 = vmax.f32 %v3296_v51, 0.0 }
 0x2c0   :  { %v2239_v59 = vmax.f32 %v3297_v53, 0.0 }
 0x2c1   :  { %v2242_v1 = vpack.c.bf16 %v2238_v56, %v2234_v54 }
 0x2c2   :  { %v2243_v60 = vpack.c.bf16 %v2239_v59, %v2235_v57 }
 0x2c4   :  { %2715 = vmatprep.mubr.bf16.mxu0 %v2243_v60 }
 0x2c5   :  { %2716 = vmatmul.mubr.bf16.vlgmr.msra.gmra.mrb[20].mxu0 %v2242_v1 }
 0x398   :  { %v2717_v58 = vpop.f32.mrb[20].mxu0 }
 0x399   :  { %v3298_v63 = vadd.f32 %v2717_v58, %v2313_v62  ;;  %v2719_v0 = vpop.f32.mrb[21].mxu0 }
 0x39a   :  { %v3299_v3 = vadd.f32 %v2719_v0, %v2317_v32  ;;  %v2721_v4 = vpop.f32.mrb[22].mxu0 }
 0x39b   :  { %v3300_v5 = vadd.f32 %v2721_v4, %v2313_v62  ;;  %v2723_v6 = vpop.f32.mrb[23].mxu0  ;;  %v2726_v8 = vmax.f32 %v3298_v63, 0.0 }
 0x39c   :  { %v3301_v7 = vadd.f32 %v2723_v6, %v2317_v32  ;;  %v2727_v10 = vmax.f32 %v3299_v3, 0.0 }
 0x39d   :  { %v2728_v9 = vmax.f32 %v3300_v5, 0.0 }
 0x39e   :  { %v2729_v11 = vmax.f32 %v3301_v7, 0.0 }
 0x39f   :  { %v2730_v12 = vpack.c.bf16 %v2728_v9, %v2726_v8 }
 0x3a0   :  { %v2731_v13 = vpack.c.bf16 %v2729_v11, %v2727_v10 }
 0x3a2   :  { %2899 = vmatprep.mubr.bf16.mxu1 %v2731_v13 }
 0x3a3   :  { %2900 = vmatmul.mubr.bf16.vlgmr.msra.gmra.mrb[8].mxu1 %v2730_v12 }
 0x476   :  { %v3280_v14 = vpop.f32.mrb[8].mxu1 }
 0x477   :  { %v3281_v24 = vpop.f32.mrb[9].mxu1 }
 0x478   :  { %v3282_v15 = vadd.f32 %v3281_v24, %v3280_v14  ;;  %v3283_v16 = vpop.f32.mrb[10].mxu1 }
 0x479   :  { %v3284_v17 = vpop.f32.mrb[11].mxu1 }
 0x47a   :  { %v2902_v18 = vadd.f32 %v3282_v15, %v3247_v22  ;;  %v3285_v19 = vadd.f32 %v3284_v17, %v3283_v16 }
 0x47c   :  { %2908 = vst [vmem:[%s5013_s9] sm:$0xff] %v2902_v18  ;;  %v2905_v20 = vadd.f32 %v3285_v19, %v3247_v22 }
 0x47e   :  { %2909 = vst [vmem:[%s5013_s9 + $0x8] sm:$0xff] %v2905_v20 }

</bundles_post_ra>
